<compile_context>
chip_gen: v7x
topology: tpu7x:2x2x1
jax: 0.10.0
libtpu: 0.0.40
codegen_flags: <defaults>
</compile_context>

<pallas_src>
import math
import jax
import jax.numpy as jnp
from jax.experimental import pallas as pl
from jax.experimental.pallas import tpu as pltpu


def lstm_kernel(x_ref,                       # (T*B, D)  time-major, flattened
                wih0_ref, whh0_ref, b0_ref,  # (D,4H) (H,4H) (1,4H)   [i,f,o,g]
                w1_ref, b1_ref,              # (2H,4H) (1,4H)         [i,f,o,g]
                fc1w_ref, fc1b_ref,          # (H,16) (1,16)
                fc2w_ref, fc2b_ref,          # (16,1) (1,1)
                out_ref,                     # (B, 1)
                gx0_ref):                    # scratch (T*B, 4H)
    TB = x_ref.shape[0]
    H = whh0_ref.shape[0]
    H4 = 4 * H
    B = out_ref.shape[0]
    T = TB // B

    # Hoisted loads / broadcasts (done once, outside the recurrent loop).
    whh0 = whh0_ref[...]                                     # (H, 4H)
    w1 = w1_ref[...]                                         # (2H, 4H)
    b1 = jnp.broadcast_to(b1_ref[...], (B, H4))              # (B, 4H)

    # Hoisted layer-0 input projection: one (T*B, D) @ (D, 4H) matmul + bias.
    gx0_ref[...] = (jnp.dot(x_ref[...], wih0_ref[...],
                            preferred_element_type=jnp.float32)
                    + b0_ref[...])

    def activations(gates):
        # Gate order [i, f, o, g]: one sigmoid over 3H contiguous lanes + one tanh.
        sfo = jax.nn.sigmoid(gates[:, :3 * H])
        i = sfo[:, 0:H]
        f = sfo[:, H:2 * H]
        o = sfo[:, 2 * H:3 * H]
        g = jnp.tanh(gates[:, 3 * H:])
        return i, f, o, g

    def body(t, carry):
        h0, c0, h1, c1 = carry

        # Layer 0: precomputed input gates + single recurrent matmul.
        gx_t = gx0_ref[pl.ds(t * B, B), :]                   # (B, 4H) lane-dense
        g0 = gx_t + jnp.dot(h0, whh0, preferred_element_type=jnp.float32)
        i0, f0, o0, gg0 = activations(g0)
        c0 = f0 * c0 + i0 * gg0
        h0 = o0 * jnp.tanh(c0)

        # Layer 1: single fused matmul on [h0 | h1].
        hcat = jnp.concatenate([h0, h1], axis=1)             # (B, 2H)
        g1 = jnp.dot(hcat, w1, preferred_element_type=jnp.float32) + b1
        i1, f1, o1, gg1 = activations(g1)
        c1 = f1 * c1 + i1 * gg1
        h1 = o1 * jnp.tanh(c1)

        return (h0, c0, h1, c1)

    zeros = jnp.zeros((B, H), jnp.float32)
    _, _, h1, _ = jax.lax.fori_loop(0, T, body, (zeros, zeros, zeros, zeros),
                                    unroll=True)

    # Head: out[:, -1, :] == final h of top layer -> fc1 -> ReLU -> fc2.
    fc1 = jnp.maximum(
        jnp.dot(h1, fc1w_ref[...], preferred_element_type=jnp.float32)
        + fc1b_ref[...], 0.0)
    out_ref[...] = (jnp.dot(fc1, fc2w_ref[...], preferred_element_type=jnp.float32)
                    + fc2b_ref[...])


def _reorder_gates(arr, axis):
    """Permute the 4H gate axis from PyTorch [i, f, g, o] to [i, f, o, g]."""
    i, f, g, o = jnp.split(arr, 4, axis=axis)
    return jnp.concatenate([i, f, o, g], axis=axis)


def init_params(key, input_dim, hidden_dim):
    """PyTorch-shaped parameters, deterministic uniform(-k, k) init."""
    k = 1.0 / math.sqrt(hidden_dim)
    keys = jax.random.split(key, 14)
    u = lambda kk, shape: jax.random.uniform(kk, shape, jnp.float32, -k, k)
    H4 = 4 * hidden_dim
    return {
        "weight_ih_l0": u(keys[0], (H4, input_dim)),
        "weight_hh_l0": u(keys[1], (H4, hidden_dim)),
        "bias_ih_l0":   u(keys[2], (H4,)),
        "bias_hh_l0":   u(keys[3], (H4,)),
        "weight_ih_l1": u(keys[4], (H4, hidden_dim)),
        "weight_hh_l1": u(keys[5], (H4, hidden_dim)),
        "bias_ih_l1":   u(keys[6], (H4,)),
        "bias_hh_l1":   u(keys[7], (H4,)),
        "fc1_w":        u(keys[8], (16, hidden_dim)),
        "fc1_b":        u(keys[9], (16,)),
        "fc2_w":        u(keys[10], (1, 16)),
        "fc2_b":        u(keys[11], (1,)),
    }


def lstm_forward_pallas(x, p):
    """x: (B, T, D) float32  ->  (B, 1) float32"""
    B, T, D = x.shape
    H = p["weight_hh_l0"].shape[1]
    H4 = 4 * H

    # Time-major flattened input: rows ordered [t0:b0,b1, t1:b0,b1, ...].
    x_flat = jnp.transpose(x, (1, 0, 2)).reshape(T * B, D)

    def prep(wih, whh, bih, bhh):
        wih_t = _reorder_gates(wih.T, axis=1)                 # (in, 4H)
        whh_t = _reorder_gates(whh.T, axis=1)                 # (H, 4H)
        b = _reorder_gates((bih + bhh).reshape(1, -1), axis=1)  # (1, 4H)
        return wih_t, whh_t, b

    wih0, whh0, b0 = prep(p["weight_ih_l0"], p["weight_hh_l0"],
                          p["bias_ih_l0"], p["bias_hh_l0"])
    wih1, whh1, b1 = prep(p["weight_ih_l1"], p["weight_hh_l1"],
                          p["bias_ih_l1"], p["bias_hh_l1"])
    w1 = jnp.concatenate([wih1, whh1], axis=0)                # (2H, 4H) fused

    fc1w = p["fc1_w"].T                                       # (H, 16)
    fc1b = p["fc1_b"].reshape(1, -1)                          # (1, 16)
    fc2w = p["fc2_w"].T                                       # (16, 1)
    fc2b = p["fc2_b"].reshape(1, -1)                          # (1, 1)

    vmem = pl.BlockSpec(memory_space=pltpu.MemorySpace.VMEM)
    out = pl.pallas_call(
        lstm_kernel,
        out_shape=jax.ShapeDtypeStruct((B, 1), jnp.float32),
        in_specs=[vmem] * 10,
        out_specs=vmem,
        scratch_shapes=[pltpu.VMEM((T * B, H4), jnp.float32)],
    )(x_flat, wih0, whh0, b0, w1, b1, fc1w, fc1b, fc2w, fc2b)
    return out


def lstm_forward_ref(x, p):
    """Pure-JAX reference matching torch.nn.LSTM + fc semantics."""
    B, T, D = x.shape
    H = p["weight_hh_l0"].shape[1]

    def layer(x_seq, wih, whh, bih, bhh):
        def step(carry, x_t):
            h, c = carry
            gates = x_t @ wih.T + bih + h @ whh.T + bhh
            i, f, g, o = jnp.split(gates, 4, axis=-1)
            i, f, o = jax.nn.sigmoid(i), jax.nn.sigmoid(f), jax.nn.sigmoid(o)
            g = jnp.tanh(g)
            c = f * c + i * g
            h = o * jnp.tanh(c)
            return (h, c), h
        h0 = jnp.zeros((B, H), jnp.float32)
        (_, _), hs = jax.lax.scan(step, (h0, h0), jnp.transpose(x_seq, (1, 0, 2)))
        return jnp.transpose(hs, (1, 0, 2))

    out = layer(x, p["weight_ih_l0"], p["weight_hh_l0"],
                p["bias_ih_l0"], p["bias_hh_l0"])
    out = layer(out, p["weight_ih_l1"], p["weight_hh_l1"],
                p["bias_ih_l1"], p["bias_hh_l1"])
    out = out[:, -1, :]
    out = jnp.maximum(out @ p["fc1_w"].T + p["fc1_b"], 0.0)
    return out @ p["fc2_w"].T + p["fc2_b"]


if __name__ == "__main__":
    # Small shapes consistent with the module's forward (hidden scaled down;
    # 4H = 128 exactly fills a vreg lane width).
    batch, seq, input_dim, hidden_dim = 2, 8, 23, 32

    key = jax.random.PRNGKey(0)
    kx, kp = jax.random.split(key)
    x = jax.random.normal(kx, (batch, seq, input_dim), jnp.float32)
    params = init_params(kp, input_dim, hidden_dim)

    y = jax.block_until_ready(lstm_forward_pallas(x, params))
    y_ref = jax.block_until_ready(lstm_forward_ref(x, params))

    assert y.shape == (batch, 1)
    assert jnp.allclose(y, y_ref, atol=1e-5, rtol=1e-5), (y, y_ref)
    print("KERNEL_OK")
</pallas_src>

<mosaic_0001>
module attributes {stable_mosaic.version = 11 : i64} {
  func.func @lstm_kernel(%arg0: memref<16x23xf32, #tpu.memory_space<vmem>>, %arg1: memref<23x128xf32, #tpu.memory_space<vmem>>, %arg2: memref<32x128xf32, #tpu.memory_space<vmem>>, %arg3: memref<1x128xf32, #tpu.memory_space<vmem>>, %arg4: memref<64x128xf32, #tpu.memory_space<vmem>>, %arg5: memref<1x128xf32, #tpu.memory_space<vmem>>, %arg6: memref<32x16xf32, #tpu.memory_space<vmem>>, %arg7: memref<1x16xf32, #tpu.memory_space<vmem>>, %arg8: memref<16x1xf32, #tpu.memory_space<vmem>>, %arg9: memref<1x1xf32, #tpu.memory_space<vmem>>, %arg10: memref<2x1xf32, #tpu.memory_space<vmem>>, %arg11: memref<16x128xf32, #tpu.memory_space<vmem>>) attributes {dimension_semantics = [], scalar_prefetch = 0 : i64, scratch_operands = 1 : i64, tpu.core_type = #tpu.core_type<tc>} {
    %c0 = arith.constant 0 : index
    %c0_0 = arith.constant 0 : index
    %0 = vector.load %arg2[%c0, %c0_0] : memref<32x128xf32, #tpu.memory_space<vmem>>, vector<32x128xf32>
    %c0_1 = arith.constant 0 : index
    %c0_2 = arith.constant 0 : index
    %1 = vector.load %arg4[%c0_1, %c0_2] : memref<64x128xf32, #tpu.memory_space<vmem>>, vector<64x128xf32>
    %c0_3 = arith.constant 0 : index
    %c0_4 = arith.constant 0 : index
    %2 = vector.load %arg5[%c0_3, %c0_4] : memref<1x128xf32, #tpu.memory_space<vmem>>, vector<1x128xf32>
    %3 = vector.shape_cast %2 : vector<1x128xf32> to vector<1x128xf32>
    %4 = vector.broadcast %3 : vector<1x128xf32> to vector<2x128xf32>
    %c0_5 = arith.constant 0 : index
    %c0_6 = arith.constant 0 : index
    %5 = vector.load %arg0[%c0_5, %c0_6] : memref<16x23xf32, #tpu.memory_space<vmem>>, vector<16x23xf32>
    %c0_7 = arith.constant 0 : index
    %c0_8 = arith.constant 0 : index
    %6 = vector.load %arg1[%c0_7, %c0_8] : memref<23x128xf32, #tpu.memory_space<vmem>>, vector<23x128xf32>
    %cst = arith.constant dense<0.000000e+00> : vector<16x128xf32>
    %7 = tpu.matmul %5, %6, %cst {dimension_numbers = #tpu.dot_dimension_numbers<[1], [0], [0], [1], [0, 0, 1, 1], [], []>} : vector<16x23xf32>, vector<23x128xf32>, vector<16x128xf32> -> vector<16x128xf32>
    %c0_9 = arith.constant 0 : index
    %c0_10 = arith.constant 0 : index
    %8 = vector.load %arg3[%c0_9, %c0_10] : memref<1x128xf32, #tpu.memory_space<vmem>>, vector<1x128xf32>
    %9 = vector.broadcast %8 : vector<1x128xf32> to vector<16x128xf32>
    %10 = arith.addf %7, %9 : vector<16x128xf32>
    %c0_11 = arith.constant 0 : index
    %c0_12 = arith.constant 0 : index
    %11 = vector.load %arg11[%c0_11, %c0_12] : memref<16x128xf32, #tpu.memory_space<vmem>>, vector<16x128xf32>
    tpu.vector_store %arg11[%c0_11, %c0_12], %10 {strides = array<i32>} : memref<16x128xf32, #tpu.memory_space<vmem>>, vector<16x128xf32>,
    %cst_13 = arith.constant 0.000000e+00 : f32
    %12 = vector.broadcast %cst_13 : f32 to vector<2x32xf32>
    %c0_i32 = arith.constant 0 : i32
    %c2_i32 = arith.constant 2 : i32
    %13 = arith.muli %c0_i32, %c2_i32 : i32
    %14 = arith.index_cast %13 : i32 to index
    %c0_14 = arith.constant 0 : index
    %15 = vector.load %arg11[%14, %c0_14] : memref<16x128xf32, #tpu.memory_space<vmem>>, vector<2x128xf32>
    %cst_15 = arith.constant dense<0.000000e+00> : vector<2x128xf32>
    %16 = tpu.matmul %12, %0, %cst_15 {dimension_numbers = #tpu.dot_dimension_numbers<[1], [0], [0], [1], [0, 0, 1, 1], [], []>} : vector<2x32xf32>, vector<32x128xf32>, vector<2x128xf32> -> vector<2x128xf32>
    %17 = arith.addf %15, %16 : vector<2x128xf32>
    %18 = vector.extract_strided_slice %17 {offsets = [0, 0], sizes = [2, 96], strides = [1, 1]} : vector<2x128xf32> to vector<2x96xf32>
    %19 = arith.negf %18 : vector<2x96xf32>
    %20 = math.exp %19 : vector<2x96xf32>
    %cst_16 = arith.constant 1.000000e+00 : f32
    %21 = vector.broadcast %cst_16 : f32 to vector<2x96xf32>
    %22 = arith.addf %21, %20 : vector<2x96xf32>
    %23 = arith.divf %21, %22 : vector<2x96xf32>
    %24 = vector.extract_strided_slice %23 {offsets = [0, 0], sizes = [2, 32], strides = [1, 1]} : vector<2x96xf32> to vector<2x32xf32>
    %25 = vector.extract_strided_slice %23 {offsets = [0, 32], sizes = [2, 32], strides = [1, 1]} : vector<2x96xf32> to vector<2x32xf32>
    %26 = vector.extract_strided_slice %23 {offsets = [0, 64], sizes = [2, 32], strides = [1, 1]} : vector<2x96xf32> to vector<2x32xf32>
    %27 = vector.extract_strided_slice %17 {offsets = [0, 96], sizes = [2, 32], strides = [1, 1]} : vector<2x128xf32> to vector<2x32xf32>
    %28 = math.tanh %27 : vector<2x32xf32>
    %29 = arith.mulf %25, %12 : vector<2x32xf32>
    %30 = arith.mulf %24, %28 : vector<2x32xf32>
    %31 = arith.addf %29, %30 : vector<2x32xf32>
    %32 = math.tanh %31 : vector<2x32xf32>
    %33 = arith.mulf %26, %32 : vector<2x32xf32>
    %34 = tpu.concatenate %33, %12 in 1 : vector<2x32xf32>, vector<2x32xf32> -> vector<2x64xf32>
    %cst_17 = arith.constant dense<0.000000e+00> : vector<2x128xf32>
    %35 = tpu.matmul %34, %1, %cst_17 {dimension_numbers = #tpu.dot_dimension_numbers<[1], [0], [0], [1], [0, 0, 1, 1], [], []>} : vector<2x64xf32>, vector<64x128xf32>, vector<2x128xf32> -> vector<2x128xf32>
    %36 = arith.addf %35, %4 : vector<2x128xf32>
    %37 = vector.extract_strided_slice %36 {offsets = [0, 0], sizes = [2, 96], strides = [1, 1]} : vector<2x128xf32> to vector<2x96xf32>
    %38 = arith.negf %37 : vector<2x96xf32>
    %39 = math.exp %38 : vector<2x96xf32>
    %cst_18 = arith.constant 1.000000e+00 : f32
    %40 = vector.broadcast %cst_18 : f32 to vector<2x96xf32>
    %41 = arith.addf %40, %39 : vector<2x96xf32>
    %42 = arith.divf %40, %41 : vector<2x96xf32>
    %43 = vector.extract_strided_slice %42 {offsets = [0, 0], sizes = [2, 32], strides = [1, 1]} : vector<2x96xf32> to vector<2x32xf32>
    %44 = vector.extract_strided_slice %42 {offsets = [0, 32], sizes = [2, 32], strides = [1, 1]} : vector<2x96xf32> to vector<2x32xf32>
    %45 = vector.extract_strided_slice %42 {offsets = [0, 64], sizes = [2, 32], strides = [1, 1]} : vector<2x96xf32> to vector<2x32xf32>
    %46 = vector.extract_strided_slice %36 {offsets = [0, 96], sizes = [2, 32], strides = [1, 1]} : vector<2x128xf32> to vector<2x32xf32>
    %47 = math.tanh %46 : vector<2x32xf32>
    %48 = arith.mulf %44, %12 : vector<2x32xf32>
    %49 = arith.mulf %43, %47 : vector<2x32xf32>
    %50 = arith.addf %48, %49 : vector<2x32xf32>
    %51 = math.tanh %50 : vector<2x32xf32>
    %52 = arith.mulf %45, %51 : vector<2x32xf32>
    %c1_i32 = arith.constant 1 : i32
    %c2_i32_19 = arith.constant 2 : i32
    %53 = arith.muli %c1_i32, %c2_i32_19 : i32
    %54 = arith.index_cast %53 : i32 to index
    %c0_20 = arith.constant 0 : index
    %55 = vector.load %arg11[%54, %c0_20] : memref<16x128xf32, #tpu.memory_space<vmem>>, vector<2x128xf32>
    %cst_21 = arith.constant dense<0.000000e+00> : vector<2x128xf32>
    %56 = tpu.matmul %33, %0, %cst_21 {dimension_numbers = #tpu.dot_dimension_numbers<[1], [0], [0], [1], [0, 0, 1, 1], [], []>} : vector<2x32xf32>, vector<32x128xf32>, vector<2x128xf32> -> vector<2x128xf32>
    %57 = arith.addf %55, %56 : vector<2x128xf32>
    %58 = vector.extract_strided_slice %57 {offsets = [0, 0], sizes = [2, 96], strides = [1, 1]} : vector<2x128xf32> to vector<2x96xf32>
    %59 = arith.negf %58 : vector<2x96xf32>
    %60 = math.exp %59 : vector<2x96xf32>
    %cst_22 = arith.constant 1.000000e+00 : f32
    %61 = vector.broadcast %cst_22 : f32 to vector<2x96xf32>
    %62 = arith.addf %61, %60 : vector<2x96xf32>
    %63 = arith.divf %61, %62 : vector<2x96xf32>
    %64 = vector.extract_strided_slice %63 {offsets = [0, 0], sizes = [2, 32], strides = [1, 1]} : vector<2x96xf32> to vector<2x32xf32>
    %65 = vector.extract_strided_slice %63 {offsets = [0, 32], sizes = [2, 32], strides = [1, 1]} : vector<2x96xf32> to vector<2x32xf32>
    %66 = vector.extract_strided_slice %63 {offsets = [0, 64], sizes = [2, 32], strides = [1, 1]} : vector<2x96xf32> to vector<2x32xf32>
    %67 = vector.extract_strided_slice %57 {offsets = [0, 96], sizes = [2, 32], strides = [1, 1]} : vector<2x128xf32> to vector<2x32xf32>
    %68 = math.tanh %67 : vector<2x32xf32>
    %69 = arith.mulf %65, %31 : vector<2x32xf32>
    %70 = arith.mulf %64, %68 : vector<2x32xf32>
    %71 = arith.addf %69, %70 : vector<2x32xf32>
    %72 = math.tanh %71 : vector<2x32xf32>
    %73 = arith.mulf %66, %72 : vector<2x32xf32>
    %74 = tpu.concatenate %73, %52 in 1 : vector<2x32xf32>, vector<2x32xf32> -> vector<2x64xf32>
    %cst_23 = arith.constant dense<0.000000e+00> : vector<2x128xf32>
    %75 = tpu.matmul %74, %1, %cst_23 {dimension_numbers = #tpu.dot_dimension_numbers<[1], [0], [0], [1], [0, 0, 1, 1], [], []>} : vector<2x64xf32>, vector<64x128xf32>, vector<2x128xf32> -> vector<2x128xf32>
    %76 = arith.addf %75, %4 : vector<2x128xf32>
    %77 = vector.extract_strided_slice %76 {offsets = [0, 0], sizes = [2, 96], strides = [1, 1]} : vector<2x128xf32> to vector<2x96xf32>
    %78 = arith.negf %77 : vector<2x96xf32>
    %79 = math.exp %78 : vector<2x96xf32>
    %cst_24 = arith.constant 1.000000e+00 : f32
    %80 = vector.broadcast %cst_24 : f32 to vector<2x96xf32>
    %81 = arith.addf %80, %79 : vector<2x96xf32>
    %82 = arith.divf %80, %81 : vector<2x96xf32>
    %83 = vector.extract_strided_slice %82 {offsets = [0, 0], sizes = [2, 32], strides = [1, 1]} : vector<2x96xf32> to vector<2x32xf32>
    %84 = vector.extract_strided_slice %82 {offsets = [0, 32], sizes = [2, 32], strides = [1, 1]} : vector<2x96xf32> to vector<2x32xf32>
    %85 = vector.extract_strided_slice %82 {offsets = [0, 64], sizes = [2, 32], strides = [1, 1]} : vector<2x96xf32> to vector<2x32xf32>
    %86 = vector.extract_strided_slice %76 {offsets = [0, 96], sizes = [2, 32], strides = [1, 1]} : vector<2x128xf32> to vector<2x32xf32>
    %87 = math.tanh %86 : vector<2x32xf32>
    %88 = arith.mulf %84, %50 : vector<2x32xf32>
    %89 = arith.mulf %83, %87 : vector<2x32xf32>
    %90 = arith.addf %88, %89 : vector<2x32xf32>
    %91 = math.tanh %90 : vector<2x32xf32>
    %92 = arith.mulf %85, %91 : vector<2x32xf32>
    %c2_i32_25 = arith.constant 2 : i32
    %c2_i32_26 = arith.constant 2 : i32
    %93 = arith.muli %c2_i32_25, %c2_i32_26 : i32
    %94 = arith.index_cast %93 : i32 to index
    %c0_27 = arith.constant 0 : index
    %95 = vector.load %arg11[%94, %c0_27] : memref<16x128xf32, #tpu.memory_space<vmem>>, vector<2x128xf32>
    %cst_28 = arith.constant dense<0.000000e+00> : vector<2x128xf32>
    %96 = tpu.matmul %73, %0, %cst_28 {dimension_numbers = #tpu.dot_dimension_numbers<[1], [0], [0], [1], [0, 0, 1, 1], [], []>} : vector<2x32xf32>, vector<32x128xf32>, vector<2x128xf32> -> vector<2x128xf32>
    %97 = arith.addf %95, %96 : vector<2x128xf32>
    %98 = vector.extract_strided_slice %97 {offsets = [0, 0], sizes = [2, 96], strides = [1, 1]} : vector<2x128xf32> to vector<2x96xf32>
    %99 = arith.negf %98 : vector<2x96xf32>
    %100 = math.exp %99 : vector<2x96xf32>
    %cst_29 = arith.constant 1.000000e+00 : f32
    %101 = vector.broadcast %cst_29 : f32 to vector<2x96xf32>
    %102 = arith.addf %101, %100 : vector<2x96xf32>
    %103 = arith.divf %101, %102 : vector<2x96xf32>
    %104 = vector.extract_strided_slice %103 {offsets = [0, 0], sizes = [2, 32], strides = [1, 1]} : vector<2x96xf32> to vector<2x32xf32>
    %105 = vector.extract_strided_slice %103 {offsets = [0, 32], sizes = [2, 32], strides = [1, 1]} : vector<2x96xf32> to vector<2x32xf32>
    %106 = vector.extract_strided_slice %103 {offsets = [0, 64], sizes = [2, 32], strides = [1, 1]} : vector<2x96xf32> to vector<2x32xf32>
    %107 = vector.extract_strided_slice %97 {offsets = [0, 96], sizes = [2, 32], strides = [1, 1]} : vector<2x128xf32> to vector<2x32xf32>
    %108 = math.tanh %107 : vector<2x32xf32>
    %109 = arith.mulf %105, %71 : vector<2x32xf32>
    %110 = arith.mulf %104, %108 : vector<2x32xf32>
    %111 = arith.addf %109, %110 : vector<2x32xf32>
    %112 = math.tanh %111 : vector<2x32xf32>
    %113 = arith.mulf %106, %112 : vector<2x32xf32>
    %114 = tpu.concatenate %113, %92 in 1 : vector<2x32xf32>, vector<2x32xf32> -> vector<2x64xf32>
    %cst_30 = arith.constant dense<0.000000e+00> : vector<2x128xf32>
    %115 = tpu.matmul %114, %1, %cst_30 {dimension_numbers = #tpu.dot_dimension_numbers<[1], [0], [0], [1], [0, 0, 1, 1], [], []>} : vector<2x64xf32>, vector<64x128xf32>, vector<2x128xf32> -> vector<2x128xf32>
    %116 = arith.addf %115, %4 : vector<2x128xf32>
    %117 = vector.extract_strided_slice %116 {offsets = [0, 0], sizes = [2, 96], strides = [1, 1]} : vector<2x128xf32> to vector<2x96xf32>
    %118 = arith.negf %117 : vector<2x96xf32>
    %119 = math.exp %118 : vector<2x96xf32>
    %cst_31 = arith.constant 1.000000e+00 : f32
    %120 = vector.broadcast %cst_31 : f32 to vector<2x96xf32>
    %121 = arith.addf %120, %119 : vector<2x96xf32>
    %122 = arith.divf %120, %121 : vector<2x96xf32>
    %123 = vector.extract_strided_slice %122 {offsets = [0, 0], sizes = [2, 32], strides = [1, 1]} : vector<2x96xf32> to vector<2x32xf32>
    %124 = vector.extract_strided_slice %122 {offsets = [0, 32], sizes = [2, 32], strides = [1, 1]} : vector<2x96xf32> to vector<2x32xf32>
    %125 = vector.extract_strided_slice %122 {offsets = [0, 64], sizes = [2, 32], strides = [1, 1]} : vector<2x96xf32> to vector<2x32xf32>
    %126 = vector.extract_strided_slice %116 {offsets = [0, 96], sizes = [2, 32], strides = [1, 1]} : vector<2x128xf32> to vector<2x32xf32>
    %127 = math.tanh %126 : vector<2x32xf32>
    %128 = arith.mulf %124, %90 : vector<2x32xf32>
    %129 = arith.mulf %123, %127 : vector<2x32xf32>
    %130 = arith.addf %128, %129 : vector<2x32xf32>
    %131 = math.tanh %130 : vector<2x32xf32>
    %132 = arith.mulf %125, %131 : vector<2x32xf32>
    %c3_i32 = arith.constant 3 : i32
    %c2_i32_32 = arith.constant 2 : i32
    %133 = arith.muli %c3_i32, %c2_i32_32 : i32
    %134 = arith.index_cast %133 : i32 to index
    %c0_33 = arith.constant 0 : index
    %135 = vector.load %arg11[%134, %c0_33] : memref<16x128xf32, #tpu.memory_space<vmem>>, vector<2x128xf32>
    %cst_34 = arith.constant dense<0.000000e+00> : vector<2x128xf32>
    %136 = tpu.matmul %113, %0, %cst_34 {dimension_numbers = #tpu.dot_dimension_numbers<[1], [0], [0], [1], [0, 0, 1, 1], [], []>} : vector<2x32xf32>, vector<32x128xf32>, vector<2x128xf32> -> vector<2x128xf32>
    %137 = arith.addf %135, %136 : vector<2x128xf32>
    %138 = vector.extract_strided_slice %137 {offsets = [0, 0], sizes = [2, 96], strides = [1, 1]} : vector<2x128xf32> to vector<2x96xf32>
    %139 = arith.negf %138 : vector<2x96xf32>
    %140 = math.exp %139 : vector<2x96xf32>
    %cst_35 = arith.constant 1.000000e+00 : f32
    %141 = vector.broadcast %cst_35 : f32 to vector<2x96xf32>
    %142 = arith.addf %141, %140 : vector<2x96xf32>
    %143 = arith.divf %141, %142 : vector<2x96xf32>
    %144 = vector.extract_strided_slice %143 {offsets = [0, 0], sizes = [2, 32], strides = [1, 1]} : vector<2x96xf32> to vector<2x32xf32>
    %145 = vector.extract_strided_slice %143 {offsets = [0, 32], sizes = [2, 32], strides = [1, 1]} : vector<2x96xf32> to vector<2x32xf32>
    %146 = vector.extract_strided_slice %143 {offsets = [0, 64], sizes = [2, 32], strides = [1, 1]} : vector<2x96xf32> to vector<2x32xf32>
    %147 = vector.extract_strided_slice %137 {offsets = [0, 96], sizes = [2, 32], strides = [1, 1]} : vector<2x128xf32> to vector<2x32xf32>
    %148 = math.tanh %147 : vector<2x32xf32>
    %149 = arith.mulf %145, %111 : vector<2x32xf32>
    %150 = arith.mulf %144, %148 : vector<2x32xf32>
    %151 = arith.addf %149, %150 : vector<2x32xf32>
    %152 = math.tanh %151 : vector<2x32xf32>
    %153 = arith.mulf %146, %152 : vector<2x32xf32>
    %154 = tpu.concatenate %153, %132 in 1 : vector<2x32xf32>, vector<2x32xf32> -> vector<2x64xf32>
    %cst_36 = arith.constant dense<0.000000e+00> : vector<2x128xf32>
    %155 = tpu.matmul %154, %1, %cst_36 {dimension_numbers = #tpu.dot_dimension_numbers<[1], [0], [0], [1], [0, 0, 1, 1], [], []>} : vector<2x64xf32>, vector<64x128xf32>, vector<2x128xf32> -> vector<2x128xf32>
    %156 = arith.addf %155, %4 : vector<2x128xf32>
    %157 = vector.extract_strided_slice %156 {offsets = [0, 0], sizes = [2, 96], strides = [1, 1]} : vector<2x128xf32> to vector<2x96xf32>
    %158 = arith.negf %157 : vector<2x96xf32>
    %159 = math.exp %158 : vector<2x96xf32>
    %cst_37 = arith.constant 1.000000e+00 : f32
    %160 = vector.broadcast %cst_37 : f32 to vector<2x96xf32>
    %161 = arith.addf %160, %159 : vector<2x96xf32>
    %162 = arith.divf %160, %161 : vector<2x96xf32>
    %163 = vector.extract_strided_slice %162 {offsets = [0, 0], sizes = [2, 32], strides = [1, 1]} : vector<2x96xf32> to vector<2x32xf32>
    %164 = vector.extract_strided_slice %162 {offsets = [0, 32], sizes = [2, 32], strides = [1, 1]} : vector<2x96xf32> to vector<2x32xf32>
    %165 = vector.extract_strided_slice %162 {offsets = [0, 64], sizes = [2, 32], strides = [1, 1]} : vector<2x96xf32> to vector<2x32xf32>
    %166 = vector.extract_strided_slice %156 {offsets = [0, 96], sizes = [2, 32], strides = [1, 1]} : vector<2x128xf32> to vector<2x32xf32>
    %167 = math.tanh %166 : vector<2x32xf32>
    %168 = arith.mulf %164, %130 : vector<2x32xf32>
    %169 = arith.mulf %163, %167 : vector<2x32xf32>
    %170 = arith.addf %168, %169 : vector<2x32xf32>
    %171 = math.tanh %170 : vector<2x32xf32>
    %172 = arith.mulf %165, %171 : vector<2x32xf32>
    %c4_i32 = arith.constant 4 : i32
    %c2_i32_38 = arith.constant 2 : i32
    %173 = arith.muli %c4_i32, %c2_i32_38 : i32
    %174 = arith.index_cast %173 : i32 to index
    %c0_39 = arith.constant 0 : index
    %175 = vector.load %arg11[%174, %c0_39] : memref<16x128xf32, #tpu.memory_space<vmem>>, vector<2x128xf32>
    %cst_40 = arith.constant dense<0.000000e+00> : vector<2x128xf32>
    %176 = tpu.matmul %153, %0, %cst_40 {dimension_numbers = #tpu.dot_dimension_numbers<[1], [0], [0], [1], [0, 0, 1, 1], [], []>} : vector<2x32xf32>, vector<32x128xf32>, vector<2x128xf32> -> vector<2x128xf32>
    %177 = arith.addf %175, %176 : vector<2x128xf32>
    %178 = vector.extract_strided_slice %177 {offsets = [0, 0], sizes = [2, 96], strides = [1, 1]} : vector<2x128xf32> to vector<2x96xf32>
    %179 = arith.negf %178 : vector<2x96xf32>
    %180 = math.exp %179 : vector<2x96xf32>
    %cst_41 = arith.constant 1.000000e+00 : f32
    %181 = vector.broadcast %cst_41 : f32 to vector<2x96xf32>
    %182 = arith.addf %181, %180 : vector<2x96xf32>
    %183 = arith.divf %181, %182 : vector<2x96xf32>
    %184 = vector.extract_strided_slice %183 {offsets = [0, 0], sizes = [2, 32], strides = [1, 1]} : vector<2x96xf32> to vector<2x32xf32>
    %185 = vector.extract_strided_slice %183 {offsets = [0, 32], sizes = [2, 32], strides = [1, 1]} : vector<2x96xf32> to vector<2x32xf32>
    %186 = vector.extract_strided_slice %183 {offsets = [0, 64], sizes = [2, 32], strides = [1, 1]} : vector<2x96xf32> to vector<2x32xf32>
    %187 = vector.extract_strided_slice %177 {offsets = [0, 96], sizes = [2, 32], strides = [1, 1]} : vector<2x128xf32> to vector<2x32xf32>
    %188 = math.tanh %187 : vector<2x32xf32>
    %189 = arith.mulf %185, %151 : vector<2x32xf32>
    %190 = arith.mulf %184, %188 : vector<2x32xf32>
    %191 = arith.addf %189, %190 : vector<2x32xf32>
    %192 = math.tanh %191 : vector<2x32xf32>
    %193 = arith.mulf %186, %192 : vector<2x32xf32>
    %194 = tpu.concatenate %193, %172 in 1 : vector<2x32xf32>, vector<2x32xf32> -> vector<2x64xf32>
    %cst_42 = arith.constant dense<0.000000e+00> : vector<2x128xf32>
    %195 = tpu.matmul %194, %1, %cst_42 {dimension_numbers = #tpu.dot_dimension_numbers<[1], [0], [0], [1], [0, 0, 1, 1], [], []>} : vector<2x64xf32>, vector<64x128xf32>, vector<2x128xf32> -> vector<2x128xf32>
    %196 = arith.addf %195, %4 : vector<2x128xf32>
    %197 = vector.extract_strided_slice %196 {offsets = [0, 0], sizes = [2, 96], strides = [1, 1]} : vector<2x128xf32> to vector<2x96xf32>
    %198 = arith.negf %197 : vector<2x96xf32>
    %199 = math.exp %198 : vector<2x96xf32>
    %cst_43 = arith.constant 1.000000e+00 : f32
    %200 = vector.broadcast %cst_43 : f32 to vector<2x96xf32>
    %201 = arith.addf %200, %199 : vector<2x96xf32>
    %202 = arith.divf %200, %201 : vector<2x96xf32>
    %203 = vector.extract_strided_slice %202 {offsets = [0, 0], sizes = [2, 32], strides = [1, 1]} : vector<2x96xf32> to vector<2x32xf32>
    %204 = vector.extract_strided_slice %202 {offsets = [0, 32], sizes = [2, 32], strides = [1, 1]} : vector<2x96xf32> to vector<2x32xf32>
    %205 = vector.extract_strided_slice %202 {offsets = [0, 64], sizes = [2, 32], strides = [1, 1]} : vector<2x96xf32> to vector<2x32xf32>
    %206 = vector.extract_strided_slice %196 {offsets = [0, 96], sizes = [2, 32], strides = [1, 1]} : vector<2x128xf32> to vector<2x32xf32>
    %207 = math.tanh %206 : vector<2x32xf32>
    %208 = arith.mulf %204, %170 : vector<2x32xf32>
    %209 = arith.mulf %203, %207 : vector<2x32xf32>
    %210 = arith.addf %208, %209 : vector<2x32xf32>
    %211 = math.tanh %210 : vector<2x32xf32>
    %212 = arith.mulf %205, %211 : vector<2x32xf32>
    %c5_i32 = arith.constant 5 : i32
    %c2_i32_44 = arith.constant 2 : i32
    %213 = arith.muli %c5_i32, %c2_i32_44 : i32
    %214 = arith.index_cast %213 : i32 to index
    %c0_45 = arith.constant 0 : index
    %215 = vector.load %arg11[%214, %c0_45] : memref<16x128xf32, #tpu.memory_space<vmem>>, vector<2x128xf32>
    %cst_46 = arith.constant dense<0.000000e+00> : vector<2x128xf32>
    %216 = tpu.matmul %193, %0, %cst_46 {dimension_numbers = #tpu.dot_dimension_numbers<[1], [0], [0], [1], [0, 0, 1, 1], [], []>} : vector<2x32xf32>, vector<32x128xf32>, vector<2x128xf32> -> vector<2x128xf32>
    %217 = arith.addf %215, %216 : vector<2x128xf32>
    %218 = vector.extract_strided_slice %217 {offsets = [0, 0], sizes = [2, 96], strides = [1, 1]} : vector<2x128xf32> to vector<2x96xf32>
    %219 = arith.negf %218 : vector<2x96xf32>
    %220 = math.exp %219 : vector<2x96xf32>
    %cst_47 = arith.constant 1.000000e+00 : f32
    %221 = vector.broadcast %cst_47 : f32 to vector<2x96xf32>
    %222 = arith.addf %221, %220 : vector<2x96xf32>
    %223 = arith.divf %221, %222 : vector<2x96xf32>
    %224 = vector.extract_strided_slice %223 {offsets = [0, 0], sizes = [2, 32], strides = [1, 1]} : vector<2x96xf32> to vector<2x32xf32>
    %225 = vector.extract_strided_slice %223 {offsets = [0, 32], sizes = [2, 32], strides = [1, 1]} : vector<2x96xf32> to vector<2x32xf32>
    %226 = vector.extract_strided_slice %223 {offsets = [0, 64], sizes = [2, 32], strides = [1, 1]} : vector<2x96xf32> to vector<2x32xf32>
    %227 = vector.extract_strided_slice %217 {offsets = [0, 96], sizes = [2, 32], strides = [1, 1]} : vector<2x128xf32> to vector<2x32xf32>
    %228 = math.tanh %227 : vector<2x32xf32>
    %229 = arith.mulf %225, %191 : vector<2x32xf32>
    %230 = arith.mulf %224, %228 : vector<2x32xf32>
    %231 = arith.addf %229, %230 : vector<2x32xf32>
    %232 = math.tanh %231 : vector<2x32xf32>
    %233 = arith.mulf %226, %232 : vector<2x32xf32>
    %234 = tpu.concatenate %233, %212 in 1 : vector<2x32xf32>, vector<2x32xf32> -> vector<2x64xf32>
    %cst_48 = arith.constant dense<0.000000e+00> : vector<2x128xf32>
    %235 = tpu.matmul %234, %1, %cst_48 {dimension_numbers = #tpu.dot_dimension_numbers<[1], [0], [0], [1], [0, 0, 1, 1], [], []>} : vector<2x64xf32>, vector<64x128xf32>, vector<2x128xf32> -> vector<2x128xf32>
    %236 = arith.addf %235, %4 : vector<2x128xf32>
    %237 = vector.extract_strided_slice %236 {offsets = [0, 0], sizes = [2, 96], strides = [1, 1]} : vector<2x128xf32> to vector<2x96xf32>
    %238 = arith.negf %237 : vector<2x96xf32>
    %239 = math.exp %238 : vector<2x96xf32>
    %cst_49 = arith.constant 1.000000e+00 : f32
    %240 = vector.broadcast %cst_49 : f32 to vector<2x96xf32>
    %241 = arith.addf %240, %239 : vector<2x96xf32>
    %242 = arith.divf %240, %241 : vector<2x96xf32>
    %243 = vector.extract_strided_slice %242 {offsets = [0, 0], sizes = [2, 32], strides = [1, 1]} : vector<2x96xf32> to vector<2x32xf32>
    %244 = vector.extract_strided_slice %242 {offsets = [0, 32], sizes = [2, 32], strides = [1, 1]} : vector<2x96xf32> to vector<2x32xf32>
    %245 = vector.extract_strided_slice %242 {offsets = [0, 64], sizes = [2, 32], strides = [1, 1]} : vector<2x96xf32> to vector<2x32xf32>
    %246 = vector.extract_strided_slice %236 {offsets = [0, 96], sizes = [2, 32], strides = [1, 1]} : vector<2x128xf32> to vector<2x32xf32>
    %247 = math.tanh %246 : vector<2x32xf32>
    %248 = arith.mulf %244, %210 : vector<2x32xf32>
    %249 = arith.mulf %243, %247 : vector<2x32xf32>
    %250 = arith.addf %248, %249 : vector<2x32xf32>
    %251 = math.tanh %250 : vector<2x32xf32>
    %252 = arith.mulf %245, %251 : vector<2x32xf32>
    %c6_i32 = arith.constant 6 : i32
    %c2_i32_50 = arith.constant 2 : i32
    %253 = arith.muli %c6_i32, %c2_i32_50 : i32
    %254 = arith.index_cast %253 : i32 to index
    %c0_51 = arith.constant 0 : index
    %255 = vector.load %arg11[%254, %c0_51] : memref<16x128xf32, #tpu.memory_space<vmem>>, vector<2x128xf32>
    %cst_52 = arith.constant dense<0.000000e+00> : vector<2x128xf32>
    %256 = tpu.matmul %233, %0, %cst_52 {dimension_numbers = #tpu.dot_dimension_numbers<[1], [0], [0], [1], [0, 0, 1, 1], [], []>} : vector<2x32xf32>, vector<32x128xf32>, vector<2x128xf32> -> vector<2x128xf32>
    %257 = arith.addf %255, %256 : vector<2x128xf32>
    %258 = vector.extract_strided_slice %257 {offsets = [0, 0], sizes = [2, 96], strides = [1, 1]} : vector<2x128xf32> to vector<2x96xf32>
    %259 = arith.negf %258 : vector<2x96xf32>
    %260 = math.exp %259 : vector<2x96xf32>
    %cst_53 = arith.constant 1.000000e+00 : f32
    %261 = vector.broadcast %cst_53 : f32 to vector<2x96xf32>
    %262 = arith.addf %261, %260 : vector<2x96xf32>
    %263 = arith.divf %261, %262 : vector<2x96xf32>
    %264 = vector.extract_strided_slice %263 {offsets = [0, 0], sizes = [2, 32], strides = [1, 1]} : vector<2x96xf32> to vector<2x32xf32>
    %265 = vector.extract_strided_slice %263 {offsets = [0, 32], sizes = [2, 32], strides = [1, 1]} : vector<2x96xf32> to vector<2x32xf32>
    %266 = vector.extract_strided_slice %263 {offsets = [0, 64], sizes = [2, 32], strides = [1, 1]} : vector<2x96xf32> to vector<2x32xf32>
    %267 = vector.extract_strided_slice %257 {offsets = [0, 96], sizes = [2, 32], strides = [1, 1]} : vector<2x128xf32> to vector<2x32xf32>
    %268 = math.tanh %267 : vector<2x32xf32>
    %269 = arith.mulf %265, %231 : vector<2x32xf32>
    %270 = arith.mulf %264, %268 : vector<2x32xf32>
    %271 = arith.addf %269, %270 : vector<2x32xf32>
    %272 = math.tanh %271 : vector<2x32xf32>
    %273 = arith.mulf %266, %272 : vector<2x32xf32>
    %274 = tpu.concatenate %273, %252 in 1 : vector<2x32xf32>, vector<2x32xf32> -> vector<2x64xf32>
    %cst_54 = arith.constant dense<0.000000e+00> : vector<2x128xf32>
    %275 = tpu.matmul %274, %1, %cst_54 {dimension_numbers = #tpu.dot_dimension_numbers<[1], [0], [0], [1], [0, 0, 1, 1], [], []>} : vector<2x64xf32>, vector<64x128xf32>, vector<2x128xf32> -> vector<2x128xf32>
    %276 = arith.addf %275, %4 : vector<2x128xf32>
    %277 = vector.extract_strided_slice %276 {offsets = [0, 0], sizes = [2, 96], strides = [1, 1]} : vector<2x128xf32> to vector<2x96xf32>
    %278 = arith.negf %277 : vector<2x96xf32>
    %279 = math.exp %278 : vector<2x96xf32>
    %cst_55 = arith.constant 1.000000e+00 : f32
    %280 = vector.broadcast %cst_55 : f32 to vector<2x96xf32>
    %281 = arith.addf %280, %279 : vector<2x96xf32>
    %282 = arith.divf %280, %281 : vector<2x96xf32>
    %283 = vector.extract_strided_slice %282 {offsets = [0, 0], sizes = [2, 32], strides = [1, 1]} : vector<2x96xf32> to vector<2x32xf32>
    %284 = vector.extract_strided_slice %282 {offsets = [0, 32], sizes = [2, 32], strides = [1, 1]} : vector<2x96xf32> to vector<2x32xf32>
    %285 = vector.extract_strided_slice %282 {offsets = [0, 64], sizes = [2, 32], strides = [1, 1]} : vector<2x96xf32> to vector<2x32xf32>
    %286 = vector.extract_strided_slice %276 {offsets = [0, 96], sizes = [2, 32], strides = [1, 1]} : vector<2x128xf32> to vector<2x32xf32>
    %287 = math.tanh %286 : vector<2x32xf32>
    %288 = arith.mulf %284, %250 : vector<2x32xf32>
    %289 = arith.mulf %283, %287 : vector<2x32xf32>
    %290 = arith.addf %288, %289 : vector<2x32xf32>
    %291 = math.tanh %290 : vector<2x32xf32>
    %292 = arith.mulf %285, %291 : vector<2x32xf32>
    %c7_i32 = arith.constant 7 : i32
    %c2_i32_56 = arith.constant 2 : i32
    %293 = arith.muli %c7_i32, %c2_i32_56 : i32
    %294 = arith.index_cast %293 : i32 to index
    %c0_57 = arith.constant 0 : index
    %295 = vector.load %arg11[%294, %c0_57] : memref<16x128xf32, #tpu.memory_space<vmem>>, vector<2x128xf32>
    %cst_58 = arith.constant dense<0.000000e+00> : vector<2x128xf32>
    %296 = tpu.matmul %273, %0, %cst_58 {dimension_numbers = #tpu.dot_dimension_numbers<[1], [0], [0], [1], [0, 0, 1, 1], [], []>} : vector<2x32xf32>, vector<32x128xf32>, vector<2x128xf32> -> vector<2x128xf32>
    %297 = arith.addf %295, %296 : vector<2x128xf32>
    %298 = vector.extract_strided_slice %297 {offsets = [0, 0], sizes = [2, 96], strides = [1, 1]} : vector<2x128xf32> to vector<2x96xf32>
    %299 = arith.negf %298 : vector<2x96xf32>
    %300 = math.exp %299 : vector<2x96xf32>
    %cst_59 = arith.constant 1.000000e+00 : f32
    %301 = vector.broadcast %cst_59 : f32 to vector<2x96xf32>
    %302 = arith.addf %301, %300 : vector<2x96xf32>
    %303 = arith.divf %301, %302 : vector<2x96xf32>
    %304 = vector.extract_strided_slice %303 {offsets = [0, 0], sizes = [2, 32], strides = [1, 1]} : vector<2x96xf32> to vector<2x32xf32>
    %305 = vector.extract_strided_slice %303 {offsets = [0, 32], sizes = [2, 32], strides = [1, 1]} : vector<2x96xf32> to vector<2x32xf32>
    %306 = vector.extract_strided_slice %303 {offsets = [0, 64], sizes = [2, 32], strides = [1, 1]} : vector<2x96xf32> to vector<2x32xf32>
    %307 = vector.extract_strided_slice %297 {offsets = [0, 96], sizes = [2, 32], strides = [1, 1]} : vector<2x128xf32> to vector<2x32xf32>
    %308 = math.tanh %307 : vector<2x32xf32>
    %309 = arith.mulf %305, %271 : vector<2x32xf32>
    %310 = arith.mulf %304, %308 : vector<2x32xf32>
    %311 = arith.addf %309, %310 : vector<2x32xf32>
    %312 = math.tanh %311 : vector<2x32xf32>
    %313 = arith.mulf %306, %312 : vector<2x32xf32>
    %314 = tpu.concatenate %313, %292 in 1 : vector<2x32xf32>, vector<2x32xf32> -> vector<2x64xf32>
    %cst_60 = arith.constant dense<0.000000e+00> : vector<2x128xf32>
    %315 = tpu.matmul %314, %1, %cst_60 {dimension_numbers = #tpu.dot_dimension_numbers<[1], [0], [0], [1], [0, 0, 1, 1], [], []>} : vector<2x64xf32>, vector<64x128xf32>, vector<2x128xf32> -> vector<2x128xf32>
    %316 = arith.addf %315, %4 : vector<2x128xf32>
    %317 = vector.extract_strided_slice %316 {offsets = [0, 0], sizes = [2, 96], strides = [1, 1]} : vector<2x128xf32> to vector<2x96xf32>
    %318 = arith.negf %317 : vector<2x96xf32>
    %319 = math.exp %318 : vector<2x96xf32>
    %cst_61 = arith.constant 1.000000e+00 : f32
    %320 = vector.broadcast %cst_61 : f32 to vector<2x96xf32>
    %321 = arith.addf %320, %319 : vector<2x96xf32>
    %322 = arith.divf %320, %321 : vector<2x96xf32>
    %323 = vector.extract_strided_slice %322 {offsets = [0, 0], sizes = [2, 32], strides = [1, 1]} : vector<2x96xf32> to vector<2x32xf32>
    %324 = vector.extract_strided_slice %322 {offsets = [0, 32], sizes = [2, 32], strides = [1, 1]} : vector<2x96xf32> to vector<2x32xf32>
    %325 = vector.extract_strided_slice %322 {offsets = [0, 64], sizes = [2, 32], strides = [1, 1]} : vector<2x96xf32> to vector<2x32xf32>
    %326 = vector.extract_strided_slice %316 {offsets = [0, 96], sizes = [2, 32], strides = [1, 1]} : vector<2x128xf32> to vector<2x32xf32>
    %327 = math.tanh %326 : vector<2x32xf32>
    %328 = arith.mulf %324, %290 : vector<2x32xf32>
    %329 = arith.mulf %323, %327 : vector<2x32xf32>
    %330 = arith.addf %328, %329 : vector<2x32xf32>
    %331 = math.tanh %330 : vector<2x32xf32>
    %332 = arith.mulf %325, %331 : vector<2x32xf32>
    %c8_i32 = arith.constant 8 : i32
    %c0_62 = arith.constant 0 : index
    %c0_63 = arith.constant 0 : index
    %333 = vector.load %arg6[%c0_62, %c0_63] : memref<32x16xf32, #tpu.memory_space<vmem>>, vector<32x16xf32>
    %cst_64 = arith.constant dense<0.000000e+00> : vector<2x16xf32>
    %334 = tpu.matmul %332, %333, %cst_64 {dimension_numbers = #tpu.dot_dimension_numbers<[1], [0], [0], [1], [0, 0, 1, 1], [], []>} : vector<2x32xf32>, vector<32x16xf32>, vector<2x16xf32> -> vector<2x16xf32>
    %c0_65 = arith.constant 0 : index
    %c0_66 = arith.constant 0 : index
    %335 = vector.load %arg7[%c0_65, %c0_66] : memref<1x16xf32, #tpu.memory_space<vmem>>, vector<1x16xf32>
    %336 = vector.broadcast %335 : vector<1x16xf32> to vector<2x16xf32>
    %337 = arith.addf %334, %336 : vector<2x16xf32>
    %cst_67 = arith.constant 0.000000e+00 : f32
    %338 = vector.broadcast %cst_67 : f32 to vector<2x16xf32>
    %339 = arith.maximumf %337, %338 : vector<2x16xf32>
    %c0_68 = arith.constant 0 : index
    %c0_69 = arith.constant 0 : index
    %340 = vector.load %arg8[%c0_68, %c0_69] : memref<16x1xf32, #tpu.memory_space<vmem>>, vector<16x1xf32>
    %cst_70 = arith.constant dense<0.000000e+00> : vector<2x1xf32>
    %341 = tpu.matmul %339, %340, %cst_70 {dimension_numbers = #tpu.dot_dimension_numbers<[1], [0], [0], [1], [0, 0, 1, 1], [], []>} : vector<2x16xf32>, vector<16x1xf32>, vector<2x1xf32> -> vector<2x1xf32>
    %c0_71 = arith.constant 0 : index
    %c0_72 = arith.constant 0 : index
    %342 = vector.load %arg9[%c0_71, %c0_72] : memref<1x1xf32, #tpu.memory_space<vmem>>, vector<1x1xf32>
    %343 = vector.broadcast %342 : vector<1x1xf32> to vector<2x1xf32>
    %344 = arith.addf %341, %343 : vector<2x1xf32>
    %c0_73 = arith.constant 0 : index
    %c0_74 = arith.constant 0 : index
    %345 = vector.load %arg10[%c0_73, %c0_74] : memref<2x1xf32, #tpu.memory_space<vmem>>, vector<2x1xf32>
    tpu.vector_store %arg10[%c0_73, %c0_74], %344 {strides = array<i32>} : memref<2x1xf32, #tpu.memory_space<vmem>>, vector<2x1xf32>,
    return
  }
}

</mosaic_0001>

<bundles_post_ra>
// kernel: tpu_custom_call.1
= control target key start
LH: loop header
LB: loop body
LE: loop exit
PB: predicated region body
PF: predicated region fallthrough
CT: control target
= control target key end

     0   :  { %s3271_s0 = inlined_call_operand.hbm [shape: f32[16,23], index: 0, kind: input, shape index: {}]   ;;  %s3272_s1 = inlined_call_operand.hbm [shape: f32[23,128], index: 1, kind: input, shape index: {}]   ;;  %s3273_s2 = inlined_call_operand.hbm [shape: f32[32,128], index: 2, kind: input, shape index: {}]   ;;  %s3274_s3 = inlined_call_operand.vmem [shape: f32[1,128], index: 3, kind: input, shape index: {}]   ;;  %s3275_s4 = inlined_call_operand.vmem [shape: f32[64,128], index: 4, kind: input, shape index: {}]   ;;  %s3276_s5 = inlined_call_operand.vmem [shape: f32[1,128], index: 5, kind: input, shape index: {}]   ;;  %s3277_s6 = inlined_call_operand.vmem [shape: f32[32,16], index: 6, kind: input, shape index: {}]   ;;  %s3278_s7 = inlined_call_operand.vmem [shape: f32[1,16], index: 7, kind: input, shape index: {}]   ;;  %s3279_s8 = inlined_call_operand.vmem [shape: f32[16,1], index: 8, kind: input, shape index: {}]   ;;  %s3280_s9 = inlined_call_operand.<no memory space> [shape: f32[1,1], index: 9, kind: input, shape index: {}]   ;;  %s3281_s10 = inlined_call_operand.vmem [shape: f32[2,1], index: 10, kind: output, shape index: {}]  }
   0x1   :  { %v15_v0 = vstv %s3280_s9 }
   0x2   :  { %16 = vst [vmem:[#allocation3] sm:$0x1] %v15_v0 }
   0x3   :  { %17 = vsyncpa [#allocation5], 0 }
   0x4   :  { %18 = vsyncpa [#allocation7], 0  ;;  %s2804_s15 = smov [#allocation6]   ;;  %s2805_s17 = smov [#allocation4]  }
   0x5   :  { %s36_s16 = sshll.u32 %s2804_s15, 4  ;;  %s24_s18 = sshll.u32 %s2805_s17, 4  ;;  %s37_s16 = int_to_ptr.vmem [resolvable:$true] %s36_s16  ;;  %s2873_s18 = int_to_ptr.vmem [resolvable:$true] %s24_s18 }
   0x6   :  { %s2734_s21 = scalar_lea.hbm %s3272_s1, 384 }
   0x7   :  { %p2735_p0 = scmp.ne.s32.totalorder %s3272_s1, %s2734_s21  ;;  %p2738_p1 = scmp.lt.u32.totalorder %s2734_s21, %s3272_s1 }
   0x9   :  { %p2740_p2 = pnand %p2738_p1, %p2735_p0 }
   0xb   :  { %2743 = shalt.err (!%p2740_p2)
}
   0xc   :  { %s2744_s25 = scalar_lea.vmem %s37_s16, 384  ;;  %p2749_p4 = scmp.lt.s32.totalorder %s37_s16, %s37_s16 }
   0xd   :  { %p2745_p3 = scmp.ne.s32.totalorder %s37_s16, %s2744_s25  ;;  %p2750_p5 = scmp.lt.s32.totalorder %s2744_s25, %s2744_s25 }
   0xf   :  { %p2751_p6 = por %p2750_p5, %p2749_p4 }
  0x11   :  { %p2752_p7 = pnand %p2751_p6, %p2745_p3 }
  0x13   :  { %2755 = shalt.err (!%p2752_p7)
}
  0x14   :  { %s2806_s26 = smov 128   ;;  %s2807_s27 = smov 8  }
  0x15   :  { %42 = dma.hbm_to_vmem [thread:$0]  %s3272_s1, 384, %s37_s16, [#allocation7], %s2806_s26, %s2806_s26, %s2807_s27  }
  0x16   :  { %s2756_s12 = scalar_lea.hbm %s3271_s0, 256 }
  0x17   :  { %p2757_p8 = scmp.ne.s32.totalorder %s3271_s0, %s2756_s12  ;;  %p2760_p9 = scmp.lt.u32.totalorder %s2756_s12, %s3271_s0 }
  0x19   :  { %p2762_p10 = pnand %p2760_p9, %p2757_p8 }
  0x1b   :  { %2765 = shalt.err (!%p2762_p10)
}
  0x1c   :  { %s2766_s19 = scalar_lea.vmem %s2873_s18, 256  ;;  %p2771_p12 = scmp.lt.s32.totalorder %s2873_s18, %s2873_s18 }
  0x1d   :  { %p2767_p11 = scmp.ne.s32.totalorder %s2873_s18, %s2766_s19  ;;  %p2772_p13 = scmp.lt.s32.totalorder %s2766_s19, %s2766_s19 }
  0x1f   :  { %p2773_p0 = por %p2772_p13, %p2771_p12 }
  0x21   :  { %p2774_p1 = pnand %p2773_p0, %p2767_p11 }
  0x23   :  { %2777 = shalt.err (!%p2774_p1)
}
  0x24   :  { %30 = dma.hbm_to_vmem [thread:$0]  %s3271_s0, 256, %s2873_s18, [#allocation5], %s2806_s26, %s2806_s26, %s2807_s27  }
  0x25   :  { %s2808_s20 = smov [#allocation8]   ;;  %s2778_s24 = scalar_lea.hbm %s3273_s2, 512 }
  0x26   :  { %s48_s21 = sshll.u32 %s2808_s20, 4  ;;  %p2779_p2 = scmp.ne.s32.totalorder %s3273_s2, %s2778_s24  ;;  %s49_s21 = int_to_ptr.vmem [resolvable:$true] %s48_s21 }
  0x27   :  { %p2782_p3 = scmp.lt.u32.totalorder %s2778_s24, %s3273_s2 }
  0x29   :  { %p2784_p4 = pnand %p2782_p3, %p2779_p2 }
  0x2b   :  { %2787 = shalt.err (!%p2784_p4)
}
  0x2c   :  { %s2788_s30 = scalar_lea.vmem %s49_s21, 512  ;;  %p2793_p6 = scmp.lt.s32.totalorder %s49_s21, %s49_s21 }
  0x2d   :  { %p2789_p5 = scmp.ne.s32.totalorder %s49_s21, %s2788_s30  ;;  %p2794_p7 = scmp.lt.s32.totalorder %s2788_s30, %s2788_s30 }
  0x2f   :  { %p2795_p8 = por %p2794_p7, %p2793_p6 }
  0x31   :  { %p2796_p9 = pnand %p2795_p8, %p2789_p5 }
  0x33   :  { %2799 = shalt.err (!%p2796_p9)
}
  0x34   :  { %54 = dma.hbm_to_vmem [thread:$0]  %s3273_s2, 512, %s49_s21, [#allocation7], %s2806_s26, %s2806_s26, %s2807_s27  }
  0x35   :  { %2800 = dma.done.wait [#allocation5], 256  }
  0x36   :  { %2801 = vsyncadd [#allocation5], 4294967040 }
  0x37   :  { %2802 = dma.done.wait [#allocation7], 896  }
  0x38   :  { %2803 = vsyncadd [#allocation7], 4294966400  ;;  %v2809_v1 = vmov 0.0|0.0   ;;  %vm2810_vm0 = vmmov 0   ;;  %v2811_v2 = vmov 0.0   ;;  %vm109_vm1 = vcmask 187392  }
  0x39   :  { %2442 = vmatprep.subr.bf16.mxu1 %v2809_v1  ;;  %2188 = vmatprep.mubr.msk.f32.mxu1 %vm2810_vm0, %v2811_v2  ;;  %v99_v3 = vld [vmem:[#allocation6] sm:$0xff]  ;;  %v100_v4 = vld [vmem:[#allocation6 + $0x8] sm:$0xff]  ;;  %v101_v6 = vld [vmem:[#allocation6 + $0x10] sm:$0x7f]  ;;  %vm116_vm2 = vcmask 1046528   ;;  %s2812_s27 = smov 32  }
  0x3a   :  { %v2438_v5 = vpack.c.bf16 %v100_v4, %v99_v3  ;;  %v97_v7 = vld [vmem:[#allocation4] sm:$0xff]  ;;  %v78_v8 = vld [vmem:[#allocation8] sm:$0xff]  ;;  %v79_v9 = vld [vmem:[#allocation8 + $0x8] sm:$0xff]  ;;  %s2813_s25 = smov 64   ;;  %vm198_vm3 = vcmask 261120   ;;  %vm302_vm4 = vcmask 523264  }
  0x3b   :  { %2177 = vmatprep.mubr.msk.f32.mxu0 %vm109_vm1, %v97_v7  ;;  %v80_v10 = vld [vmem:[#allocation8 + $0x10] sm:$0xff]  ;;  %v81_v11 = vld [vmem:[#allocation8 + $0x18] sm:$0xff]  ;;  %v2929_v12 = vpack.c.bf16 %v79_v9, %v78_v8  ;;  %v98_v14 = vld [vmem:[#allocation4 + $0x8] sm:$0xff]  ;;  %vm1924_vm5 = vcmask 130048   ;;  %vm1998_vm6 = vcmask 1024  }
  0x3c   :  { %2439 = vmatprep.subr.bf16.mxu0 %v2438_v5  ;;  %v2932_v13 = vpack.c.bf16 %v81_v11, %v80_v10  ;;  %v2007_v15 = vld [vmem:[%s3274_s3] ss:$0 sm:$0xff]  ;;  %v83_v35 = vld [vmem:[%s3275_s4 + $0x8] sm:$0xff]  ;;  %v84_v36 = vld [vmem:[%s3275_s4 + $0x10] sm:$0xff] }
  0x3d   :  { %2441 = vmatpush3.bf16.msra.mxu0 %v2438_v5  ;;  %2444 = vmatpush3.bf16.msra.mxu1 %v2929_v12  ;;  %v82_v34 = vld [vmem:[%s3275_s4] sm:$0xff]  ;;  %v85_v38 = vld [vmem:[%s3275_s4 + $0x18] sm:$0xff]  ;;  %v87_v41 = vld [vmem:[%s3275_s4 + $0x28] sm:$0xff] }
  0x3e   :  { %2175 = vmatprep.subr.msk.mxu0 %vm116_vm2, %v101_v6  ;;  %2445 = vmatprep.subr.bf16.mxu1 %v2809_v1  ;;  %v2965_v37 = vpack.c.bf16 %v83_v35, %v82_v34  ;;  %v2971_v39 = vpack.c.bf16 %v85_v38, %v84_v36  ;;  %v86_v40 = vld [vmem:[%s3275_s4 + $0x20] sm:$0xff]  ;;  %v88_v43 = vld [vmem:[%s3275_s4 + $0x30] sm:$0xff]  ;;  %v89_v44 = vld [vmem:[%s3275_s4 + $0x38] sm:$0xff] }
  0x3f   :  { %v2981_v42 = vpack.c.bf16 %v87_v41, %v86_v40  ;;  %v2992_v46 = vpack.c.bf16 %v89_v44, %v88_v43  ;;  %v3020_v51 = vld [vmem:[%s3276_s5] ss:$0 sm:$0xff]  ;;  %s2814_s5 = smov 96  }
  0x41   :  { %2176 = vmatpush3.msk.msra.mxu0 %vm116_vm2, %v101_v6  ;;  %2447 = vmatpush3.bf16.msra.mxu1 %v2932_v13 }
  0x42   :  { %2178 = vmatmul.mubr.msk.f32.vlgmr.msra.gmra.mrb[0].mxu0 %vm109_vm1, %v98_v14  ;;  %2448 = vmatprep.subr.bf16.mxu0 %v2809_v1 }
  0x43   :  { %2460 = vmatprep.subr.bf16.mxu1 %v2809_v1  ;;  %2207 = vmatprep.mubr.msk.f32.mxu0 %vm2810_vm0, %v2811_v2 }
  0x44   :  { %2189 = vmatmul.mubr.f32.vlgmr.msra.gmra.mrb[0].mxu1 %v2811_v2  ;;  %2450 = vmatpush3.bf16.msra.mxu0 %v2965_v37 }
  0x45   :  { %2462 = vmatpush3.bf16.msra.mxu1 %v2929_v12  ;;  %2218 = vmatprep.mubr.msk.f32.mxu1 %vm2810_vm0, %v2811_v2 }
  0x46   :  { %2463 = vmatprep.subr.bf16.mxu1 %v2809_v1  ;;  %2451 = vmatprep.subr.bf16.mxu0 %v2809_v1 }
  0x48   :  { %2453 = vmatpush3.bf16.msra.mxu0 %v2971_v39 }
  0x49   :  { %2465 = vmatpush3.bf16.msra.mxu1 %v2932_v13  ;;  %2454 = vmatprep.subr.bf16.mxu0 %v2809_v1 }
  0x4a   :  { %2466 = vmatprep.subr.bf16.mxu1 %v2809_v1 }
  0x4c   :  { %2456 = vmatpush3.bf16.msra.mxu0 %v2981_v42 }
  0x4d   :  { %2457 = vmatprep.subr.bf16.mxu0 %v2809_v1 }
  0x50   :  { %2459 = vmatpush3.bf16.msra.mxu0 %v2992_v46 }
  0x51   :  { %2478 = vmatprep.subr.bf16.mxu0 %v2809_v1 }
 0x115   :  { %v2179_v16 = vpop.f32.mrb[0].mxu0 }
 0x116   :  { %v192_v17 = vadd.f32 %v2179_v16, %v2007_v15  ;;  %v186_v18 = vpop.f32.mrb[1].mxu0 }
 0x117   :  { %v187_v19 = vadd.f32 %v2007_v15, %v186_v18  ;;  %v268_v20 = vpop.f32.mrb[0].mxu1 }
 0x118   :  { %196 = vst [vmem:[#allocation2 + $0x8] sm:$0xff] %v192_v17  ;;  %v2190_v21 = vpop.f32.mrb[1].mxu1 }
 0x119   :  { %195 = vst [vmem:[#allocation2] sm:$0xff] %v187_v19 }
 0x120   :  { %v197_v22 = vld [vmem:[#allocation2] sm:$0x3]  ;;  %v400_v52 = vld [vmem:[#allocation2 + $0x2] sm:$0x3] }
 0x121   :  { %v272_v23 = vadd.f32 %v268_v20, %v197_v22 }
 0x123   :  { %2606 = vtanh.f32 %v272_v23  ;;  %v2011_v25 = vmul.f32 -1.442695, %v272_v23 }
 0x125   :  { %2608 = vpow2.f32 %v2011_v25 }
 0x12d   :  { %v2607_v24 = vpop.eup %2606 }
 0x12e   :  { %282 = vrot.lane.b32.xlu0 %v2607_v24, %s2812_s27 }
 0x12f   :  { %v2609_v26 = vpop.eup %2608 }
 0x130   :  { %v276_v27 = vadd.f32 1.0, %v2609_v26 }
 0x132   :  { %2610 = vrcp.f32 %v276_v27 }
 0x13c   :  { %v2611_v28 = vpop.eup %2610 }
 0x13d   :  { %v280_v31 = vmul.f32 0.0, %v2611_v28 }
 0x1a0   :  { %v283_v29 = vpop.permute.xlu0 %282 }
 0x1a1   :  { %v285_v30 = vmul.f32 %v2611_v28, %v283_v29 }
 0x1a3   :  { %287 = vrot.lane.b32.xlu0 %v285_v30, %s2812_s27 }
 0x215   :  { %v288_v32 = vpop.permute.xlu0 %287 }
 0x216   :  { %v2953_v33 = vadd.f32 %v288_v32, %v280_v31 }
 0x218   :  { %2612 = vtanh.f32 %v2953_v33 }
 0x222   :  { %v2613_v45 = vpop.eup %2612 }
 0x223   :  { %293 = vrot.lane.b32.xlu1 %v2613_v45, %s2812_s27 }
 0x295   :  { %v294_v47 = vpop.permute.xlu1 %293 }
 0x296   :  { %v296_v48 = vmul.f32 %v2611_v28, %v294_v47  ;;  %v604_v28 = vld [vmem:[#allocation2 + $0x4] sm:$0x3] }
 0x298   :  { %298 = vrot.lane.b32.xlu1 %v296_v48, %s2813_s25 }
 0x30a   :  { %v299_v49 = vpop.permute.xlu1 %298 }
 0x30b   :  { %v301_v50 = vsel %vm198_vm3, %v299_v49, 0.0  ;;  %2219 = vmatmul.mubr.msk.f32.vlgmr.msra.gmra.mrb[2].mxu1 %vm198_vm3, %v299_v49 }
 0x30c   :  { %2208 = vmatmul.mubr.msk.f32.vlgmr.msra.gmra.mrb[2].mxu0 %vm302_vm4, %v301_v50  ;;  %2468 = vmatpush3.bf16.msra.mxu1 %v2965_v37 }
 0x30d   :  { %2469 = vmatprep.subr.bf16.mxu1 %v2809_v1  ;;  %2480 = vmatpush3.bf16.msra.mxu0 %v2929_v12 }
 0x30e   :  { %2481 = vmatprep.subr.bf16.mxu0 %v2809_v1  ;;  %2248 = vmatprep.mubr.msk.f32.mxu0 %vm2810_vm0, %v2811_v2 }
 0x30f   :  { %2237 = vmatprep.mubr.msk.f32.mxu1 %vm2810_vm0, %v2811_v2 }
 0x310   :  { %2471 = vmatpush3.bf16.msra.mxu1 %v2971_v39 }
 0x311   :  { %2472 = vmatprep.subr.bf16.mxu1 %v2809_v1  ;;  %2483 = vmatpush3.bf16.msra.mxu0 %v2932_v13 }
 0x312   :  { %2484 = vmatprep.subr.bf16.mxu0 %v2809_v1 }
 0x314   :  { %2474 = vmatpush3.bf16.msra.mxu1 %v2981_v42 }
 0x315   :  { %2475 = vmatprep.subr.bf16.mxu1 %v2809_v1 }
 0x318   :  { %2477 = vmatpush3.bf16.msra.mxu1 %v2992_v46 }
 0x319   :  { %2496 = vmatprep.subr.bf16.mxu1 %v2809_v1 }
 0x3de   :  { %v469_v53 = vpop.f32.mrb[2].mxu1 }
 0x3df   :  { %v473_v54 = vadd.f32 %v469_v53, %v400_v52  ;;  %v372_v55 = vpop.f32.mrb[2].mxu0  ;;  %v2220_v56 = vpop.f32.mrb[3].mxu1 }
 0x3e0   :  { %v373_v57 = vadd.f32 %v3020_v51, %v372_v55  ;;  %v2209_v58 = vpop.f32.mrb[3].mxu0 }
 0x3e1   :  { %2614 = vtanh.f32 %v473_v54  ;;  %v2015_v61 = vmul.f32 -1.442695, %v473_v54 }
 0x3e2   :  { %2616 = vtanh.f32 %v373_v57  ;;  %v2013_v62 = vmul.f32 -1.442695, %v373_v57 }
 0x3e3   :  { %2618 = vpow2.f32 %v2015_v61 }
 0x3e4   :  { %2620 = vpow2.f32 %v2013_v62 }
 0x3eb   :  { %v2615_v59 = vpop.eup %2614 }
 0x3ec   :  { %v2617_v60 = vpop.eup %2616  ;;  %483 = vrot.lane.b32.xlu1 %v2615_v59, %s2812_s27 }
 0x3ed   :  { %385 = vrot.lane.b32.xlu0 %v2617_v60, %s2812_s27  ;;  %v2619_v63 = vpop.eup %2618 }
 0x3ee   :  { %v2621_v0 = vpop.eup %2620  ;;  %v477_v3 = vadd.f32 1.0, %v2619_v63 }
 0x3ef   :  { %v379_v4 = vadd.f32 1.0, %v2621_v0 }
 0x3f0   :  { %2622 = vrcp.f32 %v477_v3 }
 0x3f1   :  { %2624 = vrcp.f32 %v379_v4 }
 0x3fa   :  { %v2623_v5 = vpop.eup %2622 }
 0x3fb   :  { %v2625_v7 = vpop.eup %2624  ;;  %v481_v11 = vmul.f32 %v2623_v5, %v2953_v33 }
 0x3fc   :  { %v383_v15 = vmul.f32 0.0, %v2625_v7 }
 0x45e   :  { %v484_v6 = vpop.permute.xlu1 %483 }
 0x45f   :  { %v486_v8 = vmul.f32 %v2623_v5, %v484_v6  ;;  %v386_v9 = vpop.permute.xlu0 %385 }
 0x460   :  { %v388_v10 = vmul.f32 %v2625_v7, %v386_v9 }
 0x461   :  { %488 = vrot.lane.b32.xlu1 %v486_v8, %s2812_s27 }
 0x462   :  { %390 = vrot.lane.b32.xlu0 %v388_v10, %s2812_s27 }
 0x4d3   :  { %v489_v14 = vpop.permute.xlu1 %488 }
 0x4d4   :  { %v3028_v16 = vadd.f32 %v489_v14, %v481_v11  ;;  %v391_v17 = vpop.permute.xlu0 %390 }
 0x4d5   :  { %v3030_v18 = vadd.f32 %v391_v17, %v383_v15 }
 0x4d6   :  { %2626 = vtanh.f32 %v3028_v16 }
 0x4d7   :  { %2628 = vtanh.f32 %v3030_v18 }
 0x4e0   :  { %v2627_v19 = vpop.eup %2626 }
 0x4e1   :  { %v2629_v20 = vpop.eup %2628  ;;  %494 = vrot.lane.b32.xlu1 %v2627_v19, %s2812_s27 }
 0x4e2   :  { %396 = vrot.lane.b32.xlu0 %v2629_v20, %s2812_s27 }
 0x553   :  { %v495_v21 = vpop.permute.xlu1 %494 }
 0x554   :  { %v497_v22 = vmul.f32 %v2623_v5, %v495_v21  ;;  %v397_v23 = vpop.permute.xlu0 %396 }
 0x555   :  { %v399_v24 = vmul.f32 %v2625_v7, %v397_v23  ;;  %v808_v7 = vld [vmem:[#allocation2 + $0x6] sm:$0x3] }
 0x556   :  { %499 = vrot.lane.b32.xlu0 %v497_v22, %s2813_s25 }
 0x557   :  { %503 = vrot.lane.b32.xlu1 %v399_v24, %s2814_s5 }
 0x5c8   :  { %v500_v25 = vpop.permute.xlu0 %499 }
 0x5c9   :  { %2249 = vmatmul.mubr.msk.f32.vlgmr.msra.gmra.mrb[4].mxu0 %vm198_vm3, %v500_v25  ;;  %v504_v26 = vpop.permute.xlu1 %503 }
 0x5ca   :  { %v506_v27 = vsel %vm198_vm3, %v500_v25, %v504_v26  ;;  %2486 = vmatpush3.bf16.msra.mxu0 %v2965_v37  ;;  %2267 = vmatprep.mubr.msk.f32.mxu0 %vm2810_vm0, %v2811_v2 }
 0x5cb   :  { %2238 = vmatmul.mubr.msk.f32.vlgmr.msra.gmra.mrb[4].mxu1 %vm302_vm4, %v506_v27  ;;  %2487 = vmatprep.subr.bf16.mxu0 %v2809_v1 }
 0x5cc   :  { %2498 = vmatpush3.bf16.msra.mxu1 %v2929_v12  ;;  %2278 = vmatprep.mubr.msk.f32.mxu1 %vm2810_vm0, %v2811_v2 }
 0x5cd   :  { %2499 = vmatprep.subr.bf16.mxu1 %v2809_v1 }
 0x5ce   :  { %2489 = vmatpush3.bf16.msra.mxu0 %v2971_v39 }
 0x5cf   :  { %2490 = vmatprep.subr.bf16.mxu0 %v2809_v1 }
 0x5d0   :  { %2501 = vmatpush3.bf16.msra.mxu1 %v2932_v13 }
 0x5d1   :  { %2502 = vmatprep.subr.bf16.mxu1 %v2809_v1 }
 0x5d2   :  { %2492 = vmatpush3.bf16.msra.mxu0 %v2981_v42 }
 0x5d3   :  { %2493 = vmatprep.subr.bf16.mxu0 %v2809_v1 }
 0x5d6   :  { %2495 = vmatpush3.bf16.msra.mxu0 %v2992_v46 }
 0x5d7   :  { %2514 = vmatprep.subr.bf16.mxu0 %v2809_v1 }
 0x69c   :  { %v673_v29 = vpop.f32.mrb[4].mxu0 }
 0x69d   :  { %v677_v30 = vadd.f32 %v673_v29, %v604_v28  ;;  %v2250_v31 = vpop.f32.mrb[5].mxu0 }
 0x69e   :  { %v576_v32 = vpop.f32.mrb[4].mxu1 }
 0x69f   :  { %2630 = vtanh.f32 %v677_v30  ;;  %v577_v33 = vadd.f32 %v3020_v51, %v576_v32  ;;  %v2239_v34 = vpop.f32.mrb[5].mxu1  ;;  %v2019_v38 = vmul.f32 -1.442695, %v677_v30 }
 0x6a1   :  { %2632 = vtanh.f32 %v577_v33  ;;  %v2017_v40 = vmul.f32 -1.442695, %v577_v33 }
 0x6a2   :  { %2634 = vpow2.f32 %v2019_v38 }
 0x6a3   :  { %2636 = vpow2.f32 %v2017_v40 }
 0x6a9   :  { %v2631_v35 = vpop.eup %2630 }
 0x6aa   :  { %687 = vrot.lane.b32.xlu1 %v2631_v35, %s2812_s27 }
 0x6ab   :  { %v2633_v36 = vpop.eup %2632 }
 0x6ac   :  { %589 = vrot.lane.b32.xlu0 %v2633_v36, %s2812_s27  ;;  %v2635_v41 = vpop.eup %2634 }
 0x6ad   :  { %v2637_v43 = vpop.eup %2636  ;;  %v681_v44 = vadd.f32 1.0, %v2635_v41 }
 0x6ae   :  { %v583_v45 = vadd.f32 1.0, %v2637_v43 }
 0x6af   :  { %2638 = vrcp.f32 %v681_v44 }
 0x6b0   :  { %2640 = vrcp.f32 %v583_v45 }
 0x6b9   :  { %v2639_v47 = vpop.eup %2638 }
 0x6ba   :  { %v2641_v50 = vpop.eup %2640  ;;  %v685_v54 = vmul.f32 %v2639_v47, %v3028_v16 }
 0x6bb   :  { %v587_v57 = vmul.f32 %v2641_v50, %v3030_v18 }
 0x71c   :  { %v688_v48 = vpop.permute.xlu1 %687 }
 0x71d   :  { %v690_v49 = vmul.f32 %v2639_v47, %v688_v48 }
 0x71e   :  { %v590_v52 = vpop.permute.xlu0 %589 }
 0x71f   :  { %692 = vrot.lane.b32.xlu1 %v690_v49, %s2812_s27  ;;  %v592_v53 = vmul.f32 %v2641_v50, %v590_v52  ;;  %v1012_v49 = vld [vmem:[#allocation2 + $0x8] sm:$0x3] }
 0x721   :  { %594 = vrot.lane.b32.xlu0 %v592_v53, %s2812_s27 }
 0x791   :  { %v693_v55 = vpop.permute.xlu1 %692 }
 0x792   :  { %v3063_v56 = vadd.f32 %v693_v55, %v685_v54 }
 0x793   :  { %v595_v58 = vpop.permute.xlu0 %594 }
 0x794   :  { %2642 = vtanh.f32 %v3063_v56  ;;  %v3067_v59 = vadd.f32 %v595_v58, %v587_v57 }
 0x796   :  { %2644 = vtanh.f32 %v3067_v59 }
 0x79e   :  { %v2643_v60 = vpop.eup %2642 }
 0x79f   :  { %698 = vrot.lane.b32.xlu1 %v2643_v60, %s2812_s27 }
 0x7a0   :  { %v2645_v61 = vpop.eup %2644 }
 0x7a1   :  { %600 = vrot.lane.b32.xlu0 %v2645_v61, %s2812_s27 }
 0x811   :  { %v699_v62 = vpop.permute.xlu1 %698 }
 0x812   :  { %v701_v63 = vmul.f32 %v2639_v47, %v699_v62 }
 0x813   :  { %v601_v0 = vpop.permute.xlu0 %600 }
 0x814   :  { %703 = vrot.lane.b32.xlu0 %v701_v63, %s2813_s25  ;;  %v603_v3 = vmul.f32 %v2641_v50, %v601_v0 }
 0x816   :  { %707 = vrot.lane.b32.xlu1 %v603_v3, %s2814_s5 }
 0x886   :  { %v704_v4 = vpop.permute.xlu0 %703 }
 0x887   :  { %2279 = vmatmul.mubr.msk.f32.vlgmr.msra.gmra.mrb[6].mxu1 %vm198_vm3, %v704_v4 }
 0x888   :  { %2504 = vmatpush3.bf16.msra.mxu1 %v2965_v37  ;;  %2297 = vmatprep.mubr.msk.f32.mxu1 %vm2810_vm0, %v2811_v2  ;;  %v708_v5 = vpop.permute.xlu1 %707 }
 0x889   :  { %2505 = vmatprep.subr.bf16.mxu1 %v2809_v1  ;;  %v710_v6 = vsel %vm198_vm3, %v704_v4, %v708_v5 }
 0x88a   :  { %2268 = vmatmul.mubr.msk.f32.vlgmr.msra.gmra.mrb[6].mxu0 %vm302_vm4, %v710_v6 }
 0x88b   :  { %2516 = vmatpush3.bf16.msra.mxu0 %v2929_v12  ;;  %2308 = vmatprep.mubr.msk.f32.mxu0 %vm2810_vm0, %v2811_v2 }
 0x88c   :  { %2507 = vmatpush3.bf16.msra.mxu1 %v2971_v39  ;;  %2517 = vmatprep.subr.bf16.mxu0 %v2809_v1 }
 0x88d   :  { %2508 = vmatprep.subr.bf16.mxu1 %v2809_v1 }
 0x88f   :  { %2519 = vmatpush3.bf16.msra.mxu0 %v2932_v13 }
 0x890   :  { %2510 = vmatpush3.bf16.msra.mxu1 %v2981_v42  ;;  %2520 = vmatprep.subr.bf16.mxu0 %v2809_v1 }
 0x891   :  { %2511 = vmatprep.subr.bf16.mxu1 %v2809_v1 }
 0x894   :  { %2513 = vmatpush3.bf16.msra.mxu1 %v2992_v46 }
 0x895   :  { %2532 = vmatprep.subr.bf16.mxu1 %v2809_v1 }
 0x95a   :  { %v877_v8 = vpop.f32.mrb[6].mxu1 }
 0x95b   :  { %v881_v9 = vadd.f32 %v877_v8, %v808_v7  ;;  %v2280_v10 = vpop.f32.mrb[7].mxu1 }
 0x95d   :  { %2646 = vtanh.f32 %v881_v9  ;;  %v780_v11 = vpop.f32.mrb[6].mxu0  ;;  %v2023_v18 = vmul.f32 -1.442695, %v881_v9 }
 0x95e   :  { %v781_v14 = vadd.f32 %v3020_v51, %v780_v11  ;;  %v2269_v15 = vpop.f32.mrb[7].mxu0 }
 0x960   :  { %2648 = vtanh.f32 %v781_v14  ;;  %v2021_v19 = vmul.f32 -1.442695, %v781_v14 }
 0x961   :  { %2650 = vpow2.f32 %v2023_v18 }
 0x962   :  { %2652 = vpow2.f32 %v2021_v19 }
 0x967   :  { %v2647_v16 = vpop.eup %2646 }
 0x968   :  { %891 = vrot.lane.b32.xlu1 %v2647_v16, %s2812_s27 }
 0x96a   :  { %v2649_v17 = vpop.eup %2648 }
 0x96b   :  { %793 = vrot.lane.b32.xlu0 %v2649_v17, %s2812_s27  ;;  %v2651_v20 = vpop.eup %2650 }
 0x96c   :  { %v885_v21 = vadd.f32 1.0, %v2651_v20  ;;  %v2653_v22 = vpop.eup %2652 }
 0x96d   :  { %v787_v23 = vadd.f32 1.0, %v2653_v22 }
 0x96e   :  { %2654 = vrcp.f32 %v885_v21 }
 0x96f   :  { %2656 = vrcp.f32 %v787_v23 }
 0x978   :  { %v2655_v24 = vpop.eup %2654 }
 0x979   :  { %v2657_v27 = vpop.eup %2656  ;;  %v889_v30 = vmul.f32 %v2655_v24, %v3063_v56 }
 0x97a   :  { %v791_v33 = vmul.f32 %v2657_v27, %v3067_v59 }
 0x9da   :  { %v892_v25 = vpop.permute.xlu1 %891 }
 0x9db   :  { %v894_v26 = vmul.f32 %v2655_v24, %v892_v25 }
 0x9dd   :  { %896 = vrot.lane.b32.xlu1 %v894_v26, %s2812_s27  ;;  %v794_v28 = vpop.permute.xlu0 %793  ;;  %v1216_v26 = vld [vmem:[#allocation2 + $0xa] sm:$0x3] }
 0x9de   :  { %v796_v29 = vmul.f32 %v2657_v27, %v794_v28 }
 0x9e0   :  { %798 = vrot.lane.b32.xlu0 %v796_v29, %s2812_s27 }
 0xa4f   :  { %v897_v31 = vpop.permute.xlu1 %896 }
 0xa50   :  { %v3099_v32 = vadd.f32 %v897_v31, %v889_v30 }
 0xa52   :  { %2658 = vtanh.f32 %v3099_v32  ;;  %v799_v34 = vpop.permute.xlu0 %798 }
 0xa53   :  { %v3103_v35 = vadd.f32 %v799_v34, %v791_v33 }
 0xa55   :  { %2660 = vtanh.f32 %v3103_v35 }
 0xa5c   :  { %v2659_v36 = vpop.eup %2658 }
 0xa5d   :  { %902 = vrot.lane.b32.xlu1 %v2659_v36, %s2812_s27 }
 0xa5f   :  { %v2661_v38 = vpop.eup %2660 }
 0xa60   :  { %804 = vrot.lane.b32.xlu0 %v2661_v38, %s2812_s27 }
 0xacf   :  { %v903_v40 = vpop.permute.xlu1 %902 }
 0xad0   :  { %v905_v41 = vmul.f32 %v2655_v24, %v903_v40 }
 0xad2   :  { %907 = vrot.lane.b32.xlu0 %v905_v41, %s2813_s25  ;;  %v805_v43 = vpop.permute.xlu0 %804 }
 0xad3   :  { %v807_v44 = vmul.f32 %v2657_v27, %v805_v43 }
 0xad5   :  { %911 = vrot.lane.b32.xlu1 %v807_v44, %s2814_s5 }
 0xb44   :  { %v908_v45 = vpop.permute.xlu0 %907 }
 0xb45   :  { %2309 = vmatmul.mubr.msk.f32.vlgmr.msra.gmra.mrb[8].mxu0 %vm198_vm3, %v908_v45 }
 0xb46   :  { %2522 = vmatpush3.bf16.msra.mxu0 %v2965_v37  ;;  %2327 = vmatprep.mubr.msk.f32.mxu0 %vm2810_vm0, %v2811_v2 }
 0xb47   :  { %2523 = vmatprep.subr.bf16.mxu0 %v2809_v1  ;;  %v912_v47 = vpop.permute.xlu1 %911 }
 0xb48   :  { %v914_v48 = vsel %vm198_vm3, %v908_v45, %v912_v47 }
 0xb49   :  { %2298 = vmatmul.mubr.msk.f32.vlgmr.msra.gmra.mrb[8].mxu1 %vm302_vm4, %v914_v48 }
 0xb4a   :  { %2525 = vmatpush3.bf16.msra.mxu0 %v2971_v39  ;;  %2534 = vmatpush3.bf16.msra.mxu1 %v2929_v12 }
 0xb4b   :  { %2526 = vmatprep.subr.bf16.mxu0 %v2809_v1  ;;  %2535 = vmatprep.subr.bf16.mxu1 %v2809_v1 }
 0xb4c   :  { %2338 = vmatprep.mubr.msk.f32.mxu1 %vm2810_vm0, %v2811_v2 }
 0xb4e   :  { %2528 = vmatpush3.bf16.msra.mxu0 %v2981_v42  ;;  %2537 = vmatpush3.bf16.msra.mxu1 %v2932_v13 }
 0xb4f   :  { %2529 = vmatprep.subr.bf16.mxu0 %v2809_v1  ;;  %2538 = vmatprep.subr.bf16.mxu1 %v2809_v1 }
 0xb52   :  { %2531 = vmatpush3.bf16.msra.mxu0 %v2992_v46 }
 0xb53   :  { %2550 = vmatprep.subr.bf16.mxu0 %v2809_v1 }
 0xc18   :  { %v1081_v50 = vpop.f32.mrb[8].mxu0 }
 0xc19   :  { %v1085_v52 = vadd.f32 %v1081_v50, %v1012_v49  ;;  %v2310_v53 = vpop.f32.mrb[9].mxu0 }
 0xc1b   :  { %2662 = vtanh.f32 %v1085_v52  ;;  %v2027_v59 = vmul.f32 -1.442695, %v1085_v52 }
 0xc1c   :  { %v984_v54 = vpop.f32.mrb[8].mxu1 }
 0xc1d   :  { %v985_v55 = vadd.f32 %v3020_v51, %v984_v54  ;;  %v2299_v56 = vpop.f32.mrb[9].mxu1 }
 0xc1f   :  { %2664 = vtanh.f32 %v985_v55  ;;  %v2025_v60 = vmul.f32 -1.442695, %v985_v55 }
 0xc20   :  { %2666 = vpow2.f32 %v2027_v59 }
 0xc21   :  { %2668 = vpow2.f32 %v2025_v60 }
 0xc25   :  { %v2663_v57 = vpop.eup %2662 }
 0xc26   :  { %1095 = vrot.lane.b32.xlu1 %v2663_v57, %s2812_s27 }
 0xc29   :  { %v2665_v58 = vpop.eup %2664 }
 0xc2a   :  { %997 = vrot.lane.b32.xlu0 %v2665_v58, %s2812_s27  ;;  %v2667_v61 = vpop.eup %2666 }
 0xc2b   :  { %v1089_v62 = vadd.f32 1.0, %v2667_v61  ;;  %v2669_v63 = vpop.eup %2668 }
 0xc2c   :  { %v991_v0 = vadd.f32 1.0, %v2669_v63 }
 0xc2d   :  { %2670 = vrcp.f32 %v1089_v62 }
 0xc2e   :  { %2672 = vrcp.f32 %v991_v0 }
 0xc37   :  { %v2671_v3 = vpop.eup %2670 }
 0xc38   :  { %v2673_v6 = vpop.eup %2672  ;;  %v1093_v9 = vmul.f32 %v2671_v3, %v3099_v32 }
 0xc39   :  { %v995_v14 = vmul.f32 %v2673_v6, %v3103_v35 }
 0xc98   :  { %v1096_v4 = vpop.permute.xlu1 %1095 }
 0xc99   :  { %v1098_v5 = vmul.f32 %v2671_v3, %v1096_v4 }
 0xc9b   :  { %1100 = vrot.lane.b32.xlu1 %v1098_v5, %s2812_s27  ;;  %v1420_v5 = vld [vmem:[#allocation2 + $0xc] sm:$0x3] }
 0xc9c   :  { %v998_v7 = vpop.permute.xlu0 %997 }
 0xc9d   :  { %v1000_v8 = vmul.f32 %v2673_v6, %v998_v7 }
 0xc9f   :  { %1002 = vrot.lane.b32.xlu0 %v1000_v8, %s2812_s27 }
 0xd0d   :  { %v1101_v10 = vpop.permute.xlu1 %1100 }
 0xd0e   :  { %v3135_v11 = vadd.f32 %v1101_v10, %v1093_v9 }
 0xd10   :  { %2674 = vtanh.f32 %v3135_v11 }
 0xd11   :  { %v1003_v15 = vpop.permute.xlu0 %1002 }
 0xd12   :  { %v3139_v16 = vadd.f32 %v1003_v15, %v995_v14 }
 0xd14   :  { %2676 = vtanh.f32 %v3139_v16 }
 0xd1a   :  { %v2675_v17 = vpop.eup %2674 }
 0xd1b   :  { %1106 = vrot.lane.b32.xlu1 %v2675_v17, %s2812_s27 }
 0xd1e   :  { %v2677_v18 = vpop.eup %2676 }
 0xd1f   :  { %1008 = vrot.lane.b32.xlu0 %v2677_v18, %s2812_s27 }
 0xd8d   :  { %v1107_v19 = vpop.permute.xlu1 %1106 }
 0xd8e   :  { %v1109_v20 = vmul.f32 %v2671_v3, %v1107_v19 }
 0xd90   :  { %1111 = vrot.lane.b32.xlu0 %v1109_v20, %s2813_s25 }
 0xd91   :  { %v1009_v21 = vpop.permute.xlu0 %1008 }
 0xd92   :  { %v1011_v22 = vmul.f32 %v2673_v6, %v1009_v21 }
 0xd94   :  { %1115 = vrot.lane.b32.xlu1 %v1011_v22, %s2814_s5 }
 0xe02   :  { %v1112_v23 = vpop.permute.xlu0 %1111 }
 0xe03   :  { %2339 = vmatmul.mubr.msk.f32.vlgmr.msra.gmra.mrb[10].mxu1 %vm198_vm3, %v1112_v23 }
 0xe04   :  { %2540 = vmatpush3.bf16.msra.mxu1 %v2965_v37  ;;  %2357 = vmatprep.mubr.msk.f32.mxu1 %vm2810_vm0, %v2811_v2 }
 0xe05   :  { %2541 = vmatprep.subr.bf16.mxu1 %v2809_v1 }
 0xe06   :  { %v1116_v24 = vpop.permute.xlu1 %1115 }
 0xe07   :  { %v1118_v25 = vsel %vm198_vm3, %v1112_v23, %v1116_v24 }
 0xe08   :  { %2543 = vmatpush3.bf16.msra.mxu1 %v2971_v39  ;;  %2328 = vmatmul.mubr.msk.f32.vlgmr.msra.gmra.mrb[10].mxu0 %vm302_vm4, %v1118_v25 }
 0xe09   :  { %2544 = vmatprep.subr.bf16.mxu1 %v2809_v1  ;;  %2552 = vmatpush3.bf16.msra.mxu0 %v2929_v12 }
 0xe0a   :  { %2368 = vmatprep.mubr.msk.f32.mxu0 %vm2810_vm0, %v2811_v2  ;;  %2553 = vmatprep.subr.bf16.mxu0 %v2809_v1 }
 0xe0c   :  { %2546 = vmatpush3.bf16.msra.mxu1 %v2981_v42 }
 0xe0d   :  { %2547 = vmatprep.subr.bf16.mxu1 %v2809_v1  ;;  %2555 = vmatpush3.bf16.msra.mxu0 %v2932_v13 }
 0xe0e   :  { %2556 = vmatprep.subr.bf16.mxu0 %v2809_v1 }
 0xe10   :  { %2549 = vmatpush3.bf16.msra.mxu1 %v2992_v46 }
 0xe11   :  { %2568 = vmatprep.subr.bf16.mxu1 %v2809_v1 }
 0xed6   :  { %v1285_v27 = vpop.f32.mrb[10].mxu1 }
 0xed7   :  { %v1289_v28 = vadd.f32 %v1285_v27, %v1216_v26  ;;  %v2340_v29 = vpop.f32.mrb[11].mxu1 }
 0xed9   :  { %2678 = vtanh.f32 %v1289_v28  ;;  %v2031_v35 = vmul.f32 -1.442695, %v1289_v28 }
 0xedb   :  { %v1188_v30 = vpop.f32.mrb[10].mxu0 }
 0xedc   :  { %v1189_v31 = vadd.f32 %v3020_v51, %v1188_v30  ;;  %v2329_v32 = vpop.f32.mrb[11].mxu0 }
 0xede   :  { %2680 = vtanh.f32 %v1189_v31  ;;  %v2029_v36 = vmul.f32 -1.442695, %v1189_v31 }
 0xedf   :  { %2682 = vpow2.f32 %v2031_v35 }
 0xee0   :  { %2684 = vpow2.f32 %v2029_v36 }
 0xee3   :  { %v2679_v33 = vpop.eup %2678 }
 0xee4   :  { %1299 = vrot.lane.b32.xlu1 %v2679_v33, %s2812_s27 }
 0xee8   :  { %v2681_v34 = vpop.eup %2680 }
 0xee9   :  { %1201 = vrot.lane.b32.xlu0 %v2681_v34, %s2812_s27  ;;  %v2683_v38 = vpop.eup %2682 }
 0xeea   :  { %v1293_v40 = vadd.f32 1.0, %v2683_v38  ;;  %v2685_v41 = vpop.eup %2684 }
 0xeeb   :  { %v1195_v43 = vadd.f32 1.0, %v2685_v41 }
 0xeec   :  { %2686 = vrcp.f32 %v1293_v40 }
 0xeed   :  { %2688 = vrcp.f32 %v1195_v43 }
 0xef6   :  { %v2687_v44 = vpop.eup %2686 }
 0xef7   :  { %v2689_v48 = vpop.eup %2688  ;;  %v1297_v52 = vmul.f32 %v2687_v44, %v3135_v11 }
 0xef8   :  { %v1199_v55 = vmul.f32 %v2689_v48, %v3139_v16 }
 0xf56   :  { %v1300_v45 = vpop.permute.xlu1 %1299 }
 0xf57   :  { %v1302_v47 = vmul.f32 %v2687_v44, %v1300_v45 }
 0xf59   :  { %1304 = vrot.lane.b32.xlu1 %v1302_v47, %s2812_s27 }
 0xf5b   :  { %v1202_v49 = vpop.permute.xlu0 %1201 }
 0xf5c   :  { %v1204_v50 = vmul.f32 %v2689_v48, %v1202_v49 }
 0xf5e   :  { %1206 = vrot.lane.b32.xlu0 %v1204_v50, %s2812_s27 }
 0xfcb   :  { %v1305_v53 = vpop.permute.xlu1 %1304 }
 0xfcc   :  { %v3171_v54 = vadd.f32 %v1305_v53, %v1297_v52 }
 0xfce   :  { %2690 = vtanh.f32 %v3171_v54 }
 0xfd0   :  { %v1207_v56 = vpop.permute.xlu0 %1206 }
 0xfd1   :  { %v3175_v57 = vadd.f32 %v1207_v56, %v1199_v55 }
 0xfd3   :  { %2692 = vtanh.f32 %v3175_v57 }
 0xfd8   :  { %v2691_v58 = vpop.eup %2690 }
 0xfd9   :  { %1310 = vrot.lane.b32.xlu1 %v2691_v58, %s2812_s27 }
 0xfdd   :  { %v2693_v59 = vpop.eup %2692 }
 0xfde   :  { %1212 = vrot.lane.b32.xlu0 %v2693_v59, %s2812_s27 }
0x104b   :  { %v1311_v60 = vpop.permute.xlu1 %1310 }
0x104c   :  { %v1313_v61 = vmul.f32 %v2687_v44, %v1311_v60 }
0x104e   :  { %1315 = vrot.lane.b32.xlu0 %v1313_v61, %s2813_s25 }
0x1050   :  { %v1213_v62 = vpop.permute.xlu0 %1212 }
0x1051   :  { %v1215_v63 = vmul.f32 %v2689_v48, %v1213_v62 }
0x1053   :  { %1319 = vrot.lane.b32.xlu1 %v1215_v63, %s2814_s5 }
0x10c0   :  { %v1316_v0 = vpop.permute.xlu0 %1315 }
0x10c1   :  { %2369 = vmatmul.mubr.msk.f32.vlgmr.msra.gmra.mrb[12].mxu0 %vm198_vm3, %v1316_v0 }
0x10c2   :  { %2558 = vmatpush3.bf16.msra.mxu0 %v2965_v37  ;;  %2387 = vmatprep.mubr.msk.f32.mxu0 %vm2810_vm0, %v2811_v2 }
0x10c3   :  { %2559 = vmatprep.subr.bf16.mxu0 %v2809_v1 }
0x10c5   :  { %v1320_v3 = vpop.permute.xlu1 %1319 }
0x10c6   :  { %2561 = vmatpush3.bf16.msra.mxu0 %v2971_v39  ;;  %v1322_v4 = vsel %vm198_vm3, %v1316_v0, %v1320_v3 }
0x10c7   :  { %2562 = vmatprep.subr.bf16.mxu0 %v2809_v1  ;;  %2358 = vmatmul.mubr.msk.f32.vlgmr.msra.gmra.mrb[12].mxu1 %vm302_vm4, %v1322_v4 }
0x10c8   :  { %2570 = vmatpush3.bf16.msra.mxu1 %v2929_v12  ;;  %2398 = vmatprep.mubr.msk.f32.mxu1 %vm2810_vm0, %v2811_v2 }
0x10c9   :  { %2571 = vmatprep.subr.bf16.mxu1 %v2809_v1 }
0x10ca   :  { %2564 = vmatpush3.bf16.msra.mxu0 %v2981_v42 }
0x10cb   :  { %2565 = vmatprep.subr.bf16.mxu0 %v2809_v1 }
0x10cc   :  { %2573 = vmatpush3.bf16.msra.mxu1 %v2932_v13 }
0x10cd   :  { %2574 = vmatprep.subr.bf16.mxu1 %v2809_v1 }
0x10ce   :  { %2567 = vmatpush3.bf16.msra.mxu0 %v2992_v46 }
0x10cf   :  { %2586 = vmatprep.subr.bf16.mxu0 %v2809_v1 }
0x1194   :  { %v1489_v6 = vpop.f32.mrb[12].mxu0 }
0x1195   :  { %v1493_v12 = vadd.f32 %v1489_v6, %v1420_v5  ;;  %v2370_v7 = vpop.f32.mrb[13].mxu0 }
0x1197   :  { %2694 = vtanh.f32 %v1493_v12  ;;  %v2035_v14 = vmul.f32 -1.442695, %v1493_v12 }
0x119a   :  { %v1392_v8 = vpop.f32.mrb[12].mxu1 }
0x119b   :  { %v1393_v9 = vadd.f32 %v3020_v51, %v1392_v8  ;;  %v2359_v10 = vpop.f32.mrb[13].mxu1 }
0x119d   :  { %2696 = vtanh.f32 %v1393_v9  ;;  %v2033_v15 = vmul.f32 -1.442695, %v1393_v9 }
0x119e   :  { %2698 = vpow2.f32 %v2035_v14 }
0x119f   :  { %2700 = vpow2.f32 %v2033_v15 }
0x11a1   :  { %v2695_v11 = vpop.eup %2694 }
0x11a2   :  { %1503 = vrot.lane.b32.xlu1 %v2695_v11, %s2812_s27 }
0x11a7   :  { %v2697_v13 = vpop.eup %2696 }
0x11a8   :  { %1405 = vrot.lane.b32.xlu0 %v2697_v13, %s2812_s27  ;;  %v2699_v16 = vpop.eup %2698 }
0x11a9   :  { %v1497_v17 = vadd.f32 1.0, %v2699_v16  ;;  %v2701_v18 = vpop.eup %2700 }
0x11aa   :  { %v1399_v19 = vadd.f32 1.0, %v2701_v18 }
0x11ab   :  { %2702 = vrcp.f32 %v1497_v17 }
0x11ac   :  { %2704 = vrcp.f32 %v1399_v19 }
0x11b5   :  { %v2703_v20 = vpop.eup %2702 }
0x11b6   :  { %v2705_v23 = vpop.eup %2704  ;;  %v1501_v26 = vmul.f32 %v2703_v20, %v3171_v54 }
0x11b7   :  { %v1403_v29 = vmul.f32 %v2705_v23, %v3175_v57 }
0x1214   :  { %v1504_v21 = vpop.permute.xlu1 %1503 }
0x1215   :  { %v1506_v22 = vmul.f32 %v2703_v20, %v1504_v21 }
0x1217   :  { %1508 = vrot.lane.b32.xlu1 %v1506_v22, %s2812_s27 }
0x121a   :  { %v1406_v24 = vpop.permute.xlu0 %1405 }
0x121b   :  { %v1408_v25 = vmul.f32 %v2705_v23, %v1406_v24 }
0x121d   :  { %1410 = vrot.lane.b32.xlu0 %v1408_v25, %s2812_s27 }
0x1289   :  { %v1509_v27 = vpop.permute.xlu1 %1508 }
0x128a   :  { %v1511_v28 = vadd.f32 %v1509_v27, %v1501_v26 }
0x128c   :  { %2706 = vtanh.f32 %v1511_v28 }
0x128f   :  { %v1411_v30 = vpop.permute.xlu0 %1410 }
0x1290   :  { %v1413_v31 = vadd.f32 %v1411_v30, %v1403_v29  ;;  %v1829_v29 = vld [vmem:[%s3277_s6 + $0x8] sm:$0xff]  ;;  %v1830_v30 = vld [vmem:[%s3277_s6 + $0x10] sm:$0xff] }
0x1292   :  { %2708 = vtanh.f32 %v1413_v31 }
0x1296   :  { %v2707_v32 = vpop.eup %2706 }
0x1297   :  { %1514 = vrot.lane.b32.xlu1 %v2707_v32, %s2812_s27  ;;  %v1831_v32 = vld [vmem:[%s3277_s6 + $0x18] sm:$0xff] }
0x129c   :  { %v2709_v33 = vpop.eup %2708 }
0x129d   :  { %1416 = vrot.lane.b32.xlu0 %v2709_v33, %s2812_s27  ;;  %v2590_v33 = vpack.c.bf16 %v1831_v32, %v1830_v30 }
0x1309   :  { %v1515_v34 = vpop.permute.xlu1 %1514 }
0x130a   :  { %v1517_v35 = vmul.f32 %v2703_v20, %v1515_v34 }
0x130c   :  { %1519 = vrot.lane.b32.xlu0 %v1517_v35, %s2813_s25 }
0x130f   :  { %v1417_v36 = vpop.permute.xlu0 %1416 }
0x1310   :  { %v1419_v38 = vmul.f32 %v2705_v23, %v1417_v36 }
0x1312   :  { %1523 = vrot.lane.b32.xlu1 %v1419_v38, %s2814_s5 }
0x137e   :  { %v1520_v40 = vpop.permute.xlu0 %1519 }
0x137f   :  { %2399 = vmatmul.mubr.msk.f32.vlgmr.msra.gmra.mrb[14].mxu1 %vm198_vm3, %v1520_v40 }
0x1380   :  { %2576 = vmatpush3.bf16.msra.mxu1 %v2965_v37  ;;  %2417 = vmatprep.mubr.msk.f32.mxu1 %vm2810_vm0, %v2811_v2  ;;  %v1624_v37 = vld [vmem:[#allocation2 + $0xe] sm:$0x3] }
0x1381   :  { %2577 = vmatprep.subr.bf16.mxu1 %v2809_v1 }
0x1384   :  { %2579 = vmatpush3.bf16.msra.mxu1 %v2971_v39  ;;  %v1524_v41 = vpop.permute.xlu1 %1523 }
0x1385   :  { %2580 = vmatprep.subr.bf16.mxu1 %v2809_v1  ;;  %v1526_v43 = vsel %vm198_vm3, %v1520_v40, %v1524_v41  ;;  %v1915_v40 = vld [vmem:[%s3279_s8] sm:$0xff] }
0x1386   :  { %2388 = vmatmul.mubr.msk.f32.vlgmr.msra.gmra.mrb[14].mxu0 %vm302_vm4, %v1526_v43  ;;  %v2042_v43 = vld [vmem:[%s3278_s7] ss:$0 sm:$0xff] }
0x1387   :  { %2428 = vmatprep.mubr.msk.f32.mxu0 %vm2810_vm0, %v2811_v2 }
0x1388   :  { %2582 = vmatpush3.bf16.msra.mxu1 %v2981_v42 }
0x1389   :  { %2583 = vmatprep.subr.bf16.mxu1 %v2809_v1 }
0x138c   :  { %2585 = vmatpush3.bf16.msra.mxu1 %v2992_v46 }
0x1452   :  { %v1693_v44 = vpop.f32.mrb[14].mxu1 }
0x1453   :  { %v1697_v45 = vadd.f32 %v1693_v44, %v1624_v37  ;;  %v2400_v39 = vpop.f32.mrb[15].mxu1 }
0x1455   :  { %2710 = vtanh.f32 %v1697_v45  ;;  %v2039_v52 = vmul.f32 -1.442695, %v1697_v45 }
0x1459   :  { %v1596_v47 = vpop.f32.mrb[14].mxu0 }
0x145a   :  { %v1597_v48 = vadd.f32 %v3020_v51, %v1596_v47  ;;  %v2389_v49 = vpop.f32.mrb[15].mxu0 }
0x145c   :  { %2712 = vtanh.f32 %v1597_v48  ;;  %v2037_v53 = vmul.f32 -1.442695, %v1597_v48 }
0x145d   :  { %2714 = vpow2.f32 %v2039_v52 }
0x145e   :  { %2716 = vpow2.f32 %v2037_v53 }
0x145f   :  { %v2711_v50 = vpop.eup %2710 }
0x1460   :  { %1707 = vrot.lane.b32.xlu1 %v2711_v50, %s2812_s27 }
0x1466   :  { %v2713_v42 = vpop.eup %2712 }
0x1467   :  { %1609 = vrot.lane.b32.xlu0 %v2713_v42, %s2812_s27  ;;  %v2715_v46 = vpop.eup %2714 }
0x1468   :  { %v1701_v54 = vadd.f32 1.0, %v2715_v46  ;;  %v2717_v55 = vpop.eup %2716 }
0x1469   :  { %v1603_v56 = vadd.f32 1.0, %v2717_v55 }
0x146a   :  { %2718 = vrcp.f32 %v1701_v54 }
0x146b   :  { %2720 = vrcp.f32 %v1603_v56 }
0x1474   :  { %v2719_v57 = vpop.eup %2718 }
0x1475   :  { %v2721_v60 = vpop.eup %2720  ;;  %v1705_v63 = vmul.f32 %v2719_v57, %v1511_v28 }
0x1476   :  { %v1607_v4 = vmul.f32 %v2721_v60, %v1413_v31 }
0x14d2   :  { %v1708_v58 = vpop.permute.xlu1 %1707 }
0x14d3   :  { %v1710_v59 = vmul.f32 %v2719_v57, %v1708_v58 }
0x14d5   :  { %1712 = vrot.lane.b32.xlu1 %v1710_v59, %s2812_s27 }
0x14d9   :  { %v1610_v61 = vpop.permute.xlu0 %1609 }
0x14da   :  { %v1612_v62 = vmul.f32 %v2721_v60, %v1610_v61 }
0x14dc   :  { %1614 = vrot.lane.b32.xlu0 %v1612_v62, %s2812_s27 }
0x1547   :  { %v1713_v0 = vpop.permute.xlu1 %1712 }
0x1548   :  { %v1715_v3 = vadd.f32 %v1713_v0, %v1705_v63 }
0x154a   :  { %2722 = vtanh.f32 %v1715_v3 }
0x154e   :  { %v1615_v5 = vpop.permute.xlu0 %1614 }
0x154f   :  { %v1617_v6 = vadd.f32 %v1615_v5, %v1607_v4 }
0x1551   :  { %2724 = vtanh.f32 %v1617_v6 }
0x1554   :  { %v2723_v12 = vpop.eup %2722 }
0x1555   :  { %1718 = vrot.lane.b32.xlu1 %v2723_v12, %s2812_s27 }
0x155b   :  { %v2725_v7 = vpop.eup %2724 }
0x155c   :  { %1620 = vrot.lane.b32.xlu0 %v2725_v7, %s2812_s27 }
0x15c7   :  { %v1719_v8 = vpop.permute.xlu1 %1718 }
0x15c8   :  { %v1721_v9 = vmul.f32 %v2719_v57, %v1719_v8 }
0x15ca   :  { %1723 = vrot.lane.b32.xlu0 %v1721_v9, %s2813_s25 }
0x15ce   :  { %v1621_v10 = vpop.permute.xlu0 %1620 }
0x15cf   :  { %v1623_v11 = vmul.f32 %v2721_v60, %v1621_v10 }
0x15d1   :  { %1727 = vrot.lane.b32.xlu1 %v1623_v11, %s2814_s5 }
0x163c   :  { %v1724_v13 = vpop.permute.xlu0 %1723 }
0x1643   :  { %v1728_v14 = vpop.permute.xlu1 %1727 }
0x1644   :  { %v1730_v15 = vsel %vm198_vm3, %v1724_v13, %v1728_v14 }
0x1645   :  { %2418 = vmatmul.mubr.msk.f32.vlgmr.msra.gmra.mrb[16].mxu1 %vm302_vm4, %v1730_v15 }
0x1718   :  { %v1800_v16 = vpop.f32.mrb[16].mxu1 }
0x1719   :  { %v1801_v17 = vadd.f32 %v3020_v51, %v1800_v16  ;;  %v2419_v18 = vpop.f32.mrb[17].mxu1  ;;  %v1828_v51 = vld [vmem:[%s3277_s6] sm:$0xff] }
0x171a   :  { %v2587_v31 = vpack.c.bf16 %v1829_v29, %v1828_v51 }
0x171b   :  { %2726 = vtanh.f32 %v1801_v17  ;;  %v2041_v20 = vmul.f32 -1.442695, %v1801_v17 }
0x171c   :  { %2588 = vmatpush3.bf16.msra.mxu0 %v2587_v31 }
0x171d   :  { %2728 = vpow2.f32 %v2041_v20  ;;  %2589 = vmatprep.subr.bf16.mxu0 %v2809_v1 }
0x1720   :  { %2591 = vmatpush3.bf16.msra.mxu0 %v2590_v33 }
0x1721   :  { %2592 = vmatprep.subr.bf16.mxu0 %v2809_v1  ;;  %v1916_v1 = vld [vmem:[%s3279_s8 + $0x8] sm:$0xff] }
0x1722   :  { %v2593_v41 = vpack.c.bf16 %v1916_v1, %v1915_v40 }
0x1725   :  { %v2727_v19 = vpop.eup %2726 }
0x1726   :  { %1813 = vrot.lane.b32.xlu0 %v2727_v19, %s2812_s27 }
0x1727   :  { %v2729_v21 = vpop.eup %2728 }
0x1728   :  { %v1807_v22 = vadd.f32 1.0, %v2729_v21 }
0x172a   :  { %2730 = vrcp.f32 %v1807_v22 }
0x1734   :  { %v2731_v23 = vpop.eup %2730 }
0x1735   :  { %v1811_v26 = vmul.f32 %v2731_v23, %v1617_v6 }
0x1798   :  { %v1814_v24 = vpop.permute.xlu0 %1813 }
0x1799   :  { %v1816_v25 = vmul.f32 %v2731_v23, %v1814_v24 }
0x179b   :  { %1818 = vrot.lane.b32.xlu1 %v1816_v25, %s2812_s27 }
0x180d   :  { %v1819_v27 = vpop.permute.xlu1 %1818 }
0x180e   :  { %v1821_v28 = vadd.f32 %v1819_v27, %v1811_v26 }
0x1810   :  { %2732 = vtanh.f32 %v1821_v28 }
0x181a   :  { %v2733_v34 = vpop.eup %2732 }
0x181b   :  { %1824 = vrot.lane.b32.xlu0 %v2733_v34, %s2812_s27 }
0x188d   :  { %v1825_v35 = vpop.permute.xlu0 %1824 }
0x188e   :  { %v1827_v36 = vmul.f32 %v2731_v23, %v1825_v35 }
0x1890   :  { %1840 = vrot.lane.b32.xlu1 %v1827_v36, %s2813_s25 }
0x1902   :  { %v1841_v38 = vpop.permute.xlu1 %1840 }
0x1903   :  { %2429 = vmatmul.mubr.msk.f32.vlgmr.msra.gmra.mrb[16].mxu0 %vm198_vm3, %v1841_v38 }
0x1904   :  { %2435 = vmatprep.mubr.msk.f32.mxu0 %vm2810_vm0, %v2811_v2  ;;  %2594 = vmatpush3.bf16.msra.mxu0 %v2593_v41  ;;  %v2044_v2 = vld [vmem:[#allocation3] ss:$0 sm:$0xff] }
0x19d6   :  { %v1910_v37 = vpop.f32.mrb[16].mxu0 }
0x19d7   :  { %v1911_v44 = vadd.f32 %v2042_v43, %v1910_v37  ;;  %v2430_v45 = vpop.f32.mrb[17].mxu0 }
0x19d9   :  { %v1914_v39 = vmax.f32 %v1911_v44, 0.0 }
0x19db   :  { %2436 = vmatmul.mubr.msk.f32.vlgmr.msra.gmra.mrb[18].mxu0 %vm1924_vm5, %v1914_v39 }
0x1aae   :  { %v1994_v47 = vpop.f32.mrb[18].mxu0 }
0x1aaf   :  { %v1995_v48 = vadd.f32 %v2044_v2, %v1994_v47  ;;  %v2437_v49 = vpop.f32.mrb[19].mxu0 }
0x1ab1   :  { %1999 = vst.msk [vmem:[%s3281_s10] sm:$0x3] %vm1998_vm6, %v1995_v48 }
0x1ab2   :  { %2004 = vsyncpa [#allocation5], 1 }
0x1ab3   :  { %2005 = vsyncpa [#allocation7], 1 }

</bundles_post_ra>
